<compile_context>
chip_gen: v7x
topology: tpu7x:2x2x1
jax: 0.10.0
libtpu: 0.0.40
codegen_flags: <defaults>
</compile_context>

<pallas_src>
import jax
import jax.numpy as jnp
from jax import lax
from jax.experimental import pallas as pl
from jax.experimental.pallas import tpu as pltpu


_MAX_UNROLL_STEPS = 32  # fully unroll the recurrence when T is at most this


def _lstm_kernel(x_ref, w_ih_ref, w_hh_ref, b_ref, h0_ref, c0_ref,
                 w_fc_ref, b_fc_ref,
                 y_ref, hn_ref, cn_ref,
                 gx_ref):
    # Shapes (all padded in the wrapper):
    #   x_ref    : (T*Bp, Din)     time-major, flattened
    #   w_ih_ref : (Din, 4*Hp)
    #   w_hh_ref : (Hp,  4*Hp)
    #   b_ref    : (1,   4*Hp)     (= b_ih + b_hh, per-gate padded)
    #   h0/c0    : (Bp, Hp)
    #   w_fc_ref : (Hp, OUTp)
    #   b_fc_ref : (1,  OUTp)
    #   gx_ref   : (T*Bp, 4*Hp)    VMEM scratch for the precomputed input gates
    TBp = x_ref.shape[0]
    Bp = h0_ref.shape[0]
    Hp = w_hh_ref.shape[0]
    T = TBp // Bp

    # One big MXU matmul for the input projection, bias folded in once.
    gx_ref[...] = (jnp.dot(x_ref[...], w_ih_ref[...],
                           preferred_element_type=jnp.float32)
                   + b_ref[...])

    w_hh = w_hh_ref[...]

    def cell(gx, h, c):
        # Single MXU matmul on the serialized path; gates_x already holds x-proj + bias.
        gates = gx + jnp.dot(h, w_hh, preferred_element_type=jnp.float32)
        # Lane-aligned static gate slices (each gate spans Hp = multiple of 128 lanes).
        i = jax.nn.sigmoid(gates[:, 0 * Hp:1 * Hp])
        f = jax.nn.sigmoid(gates[:, 1 * Hp:2 * Hp])
        g = jnp.tanh(gates[:, 2 * Hp:3 * Hp])
        o = jax.nn.sigmoid(gates[:, 3 * Hp:4 * Hp])
        c_new = f * c + i * g
        h_new = o * jnp.tanh(c_new)
        return h_new, c_new

    h = h0_ref[...]
    c = c0_ref[...]

    if T <= _MAX_UNROLL_STEPS:
        # Fully unrolled recurrence: static slab slices, scheduler sees across steps.
        for t in range(T):
            gx = gx_ref[pl.ds(t * Bp, Bp), :]
            h, c = cell(gx, h, c)
    else:
        # Long-sequence fallback: rolled loop with aligned dynamic slices.
        def step(t, carry):
            h_t, c_t = carry
            base = pl.multiple_of(t * Bp, Bp)
            gx = gx_ref[pl.ds(base, Bp), :]
            return cell(gx, h_t, c_t)
        h, c = lax.fori_loop(0, T, step, (h, c))

    hn_ref[...] = h
    cn_ref[...] = c
    y_ref[...] = (jnp.dot(h, w_fc_ref[...], preferred_element_type=jnp.float32)
                  + b_fc_ref[...])


def _full_spec(shape):
    # whole-array block resident in VMEM, no grid
    return pl.BlockSpec(shape, lambda: (0,) * len(shape))


def _round_up(x, m):
    return (x + m - 1) // m * m


def _pad_gate_cols(w, H, Hp):
    """Pad a (..., 4H) gate-stacked array to (..., 4Hp), zero-padding each gate block."""
    if Hp == H:
        return w
    parts = [jnp.pad(w[..., k * H:(k + 1) * H], ((0, 0), (0, Hp - H)))
             for k in range(4)]
    return jnp.concatenate(parts, axis=-1)


def lstm_forward(x, params, h=None):
    """x: (B, T, Din) float32 (batch_first, like PyTorch). Returns (y, (h_n, c_n))."""
    B, T, Din = x.shape
    w_ih_t = params["weight_ih_l0"]   # (4H, Din)
    w_hh_t = params["weight_hh_l0"]   # (4H, H)
    b_ih = params["bias_ih_l0"]       # (4H,)
    b_hh = params["bias_hh_l0"]       # (4H,)
    w_fc_t = params["fc_weight"]      # (out, H)
    b_fc = params["fc_bias"]          # (out,)
    H = w_hh_t.shape[1]
    OUT = w_fc_t.shape[0]

    # Padded (lane/sublane-aligned) sizes.
    Bp = _round_up(B, 8)
    Hp = _round_up(H, 128)
    OUTp = _round_up(OUT, 128)

    if h is None:
        h0 = jnp.zeros((B, H), jnp.float32)
        c0 = jnp.zeros((B, H), jnp.float32)
    else:
        h0 = h[0][0].astype(jnp.float32)
        c0 = h[1][0].astype(jnp.float32)

    # ---- layout conversion / zero padding (done once, outside the recurrence) ----
    # Time-major, batch padded to sublanes, flattened so timestep t is rows [t*Bp, (t+1)*Bp).
    x_tm = jnp.transpose(x.astype(jnp.float32), (1, 0, 2))          # (T, B, Din)
    x_tm = jnp.pad(x_tm, ((0, 0), (0, Bp - B), (0, 0)))             # (T, Bp, Din)
    x_flat = x_tm.reshape(T * Bp, Din)                              # (T*Bp, Din)

    w_ih = _pad_gate_cols(jnp.transpose(w_ih_t), H, Hp)             # (Din, 4Hp)
    w_hh = jnp.pad(_pad_gate_cols(jnp.transpose(w_hh_t), H, Hp),
                   ((0, Hp - H), (0, 0)))                           # (Hp, 4Hp)
    b = _pad_gate_cols((b_ih + b_hh).reshape(1, 4 * H), H, Hp)      # (1, 4Hp)
    w_fc = jnp.pad(jnp.transpose(w_fc_t),
                   ((0, Hp - H), (0, OUTp - OUT)))                  # (Hp, OUTp)
    b_fc2 = jnp.pad(b_fc.reshape(1, OUT), ((0, 0), (0, OUTp - OUT)))  # (1, OUTp)
    h0_p = jnp.pad(h0, ((0, Bp - B), (0, Hp - H)))                  # (Bp, Hp)
    c0_p = jnp.pad(c0, ((0, Bp - B), (0, Hp - H)))                  # (Bp, Hp)

    y_p, hn_p, cn_p = pl.pallas_call(
        _lstm_kernel,
        out_shape=(
            jax.ShapeDtypeStruct((Bp, OUTp), jnp.float32),
            jax.ShapeDtypeStruct((Bp, Hp), jnp.float32),
            jax.ShapeDtypeStruct((Bp, Hp), jnp.float32),
        ),
        in_specs=[
            _full_spec((T * Bp, Din)),
            _full_spec((Din, 4 * Hp)),
            _full_spec((Hp, 4 * Hp)),
            _full_spec((1, 4 * Hp)),
            _full_spec((Bp, Hp)),
            _full_spec((Bp, Hp)),
            _full_spec((Hp, OUTp)),
            _full_spec((1, OUTp)),
        ],
        out_specs=(
            _full_spec((Bp, OUTp)),
            _full_spec((Bp, Hp)),
            _full_spec((Bp, Hp)),
        ),
        scratch_shapes=[pltpu.VMEM((T * Bp, 4 * Hp), jnp.float32)],
    )(x_flat, w_ih, w_hh, b, h0_p, c0_p, w_fc, b_fc2)

    # Strip padding; reshape recurrent state to PyTorch's (1, B, H).
    y = y_p[:B, :OUT]
    h_n = hn_p[:B, :H][None, :, :]
    c_n = cn_p[:B, :H][None, :, :]
    return y, (h_n, c_n)


def _lstm_ref(x, params, h=None):
    """Pure-JAX reference with identical semantics, for verification."""
    B, T, Din = x.shape
    w_ih = params["weight_ih_l0"]
    w_hh = params["weight_hh_l0"]
    b = params["bias_ih_l0"] + params["bias_hh_l0"]
    w_fc = params["fc_weight"]
    b_fc = params["fc_bias"]
    H = w_hh.shape[1]
    hs = jnp.zeros((B, H), jnp.float32) if h is None else h[0][0]
    cs = jnp.zeros((B, H), jnp.float32) if h is None else h[1][0]
    for t in range(T):
        gates = x[:, t] @ w_ih.T + hs @ w_hh.T + b
        i = jax.nn.sigmoid(gates[:, 0 * H:1 * H])
        f = jax.nn.sigmoid(gates[:, 1 * H:2 * H])
        g = jnp.tanh(gates[:, 2 * H:3 * H])
        o = jax.nn.sigmoid(gates[:, 3 * H:4 * H])
        cs = f * cs + i * g
        hs = o * jnp.tanh(cs)
    y = hs @ w_fc.T + b_fc
    return y, (hs[None], cs[None])


def init_params(key, hidden_size, in_size=1, out_size=1):
    """Deterministic synthetic init mimicking PyTorch's U(-1/sqrt(H), 1/sqrt(H))."""
    k = 1.0 / jnp.sqrt(jnp.float32(hidden_size))
    keys = jax.random.split(key, 6)
    u = lambda kk, shape: jax.random.uniform(kk, shape, jnp.float32, -k, k)
    return {
        "weight_ih_l0": u(keys[0], (4 * hidden_size, in_size)),
        "weight_hh_l0": u(keys[1], (4 * hidden_size, hidden_size)),
        "bias_ih_l0": u(keys[2], (4 * hidden_size,)),
        "bias_hh_l0": u(keys[3], (4 * hidden_size,)),
        "fc_weight": u(keys[4], (out_size, hidden_size)),
        "fc_bias": u(keys[5], (out_size,)),
    }


if __name__ == "__main__":
    B, T, IN, H, OUT = 2, 8, 1, 32, 1
    key = jax.random.PRNGKey(0)
    pkey, xkey, hkey = jax.random.split(key, 3)
    params = init_params(pkey, H, IN, OUT)
    x = jax.random.normal(xkey, (B, T, IN), jnp.float32)

    # Case 1: default (zero) initial state.
    y, (h_n, c_n) = lstm_forward(x, params)
    jax.block_until_ready((y, h_n, c_n))
    y_ref, (h_ref, c_ref) = _lstm_ref(x, params)
    assert y.shape == (B, OUT) and h_n.shape == (1, B, H) and c_n.shape == (1, B, H)
    assert jnp.allclose(y, y_ref, atol=1e-5, rtol=1e-5)
    assert jnp.allclose(h_n, h_ref, atol=1e-5, rtol=1e-5)
    assert jnp.allclose(c_n, c_ref, atol=1e-5, rtol=1e-5)

    # Case 2: user-provided (h0, c0), like PyTorch's optional `h` argument.
    hk1, hk2 = jax.random.split(hkey)
    h0 = 0.1 * jax.random.normal(hk1, (1, B, H), jnp.float32)
    c0 = 0.1 * jax.random.normal(hk2, (1, B, H), jnp.float32)
    y2, (h_n2, c_n2) = lstm_forward(x, params, (h0, c0))
    jax.block_until_ready((y2, h_n2, c_n2))
    y2_ref, (h2_ref, c2_ref) = _lstm_ref(x, params, (h0, c0))
    assert jnp.allclose(y2, y2_ref, atol=1e-5, rtol=1e-5)
    assert jnp.allclose(h_n2, h2_ref, atol=1e-5, rtol=1e-5)
    assert jnp.allclose(c_n2, c2_ref, atol=1e-5, rtol=1e-5)

    print("KERNEL_OK")
</pallas_src>

<mosaic_0001>
module attributes {stable_mosaic.version = 11 : i64} {
  func.func @_lstm_kernel(%arg0: memref<64x1xf32, #tpu.memory_space<vmem>>, %arg1: memref<1x512xf32, #tpu.memory_space<vmem>>, %arg2: memref<128x512xf32, #tpu.memory_space<vmem>>, %arg3: memref<1x512xf32, #tpu.memory_space<vmem>>, %arg4: memref<8x128xf32, #tpu.memory_space<vmem>>, %arg5: memref<8x128xf32, #tpu.memory_space<vmem>>, %arg6: memref<128x128xf32, #tpu.memory_space<vmem>>, %arg7: memref<1x128xf32, #tpu.memory_space<vmem>>, %arg8: memref<8x128xf32, #tpu.memory_space<vmem>>, %arg9: memref<8x128xf32, #tpu.memory_space<vmem>>, %arg10: memref<8x128xf32, #tpu.memory_space<vmem>>, %arg11: memref<64x512xf32, #tpu.memory_space<vmem>>) attributes {dimension_semantics = [], scalar_prefetch = 0 : i64, scratch_operands = 1 : i64, tpu.core_type = #tpu.core_type<tc>} {
    %c0 = arith.constant 0 : index
    %c0_0 = arith.constant 0 : index
    %0 = vector.load %arg0[%c0, %c0_0] : memref<64x1xf32, #tpu.memory_space<vmem>>, vector<64x1xf32>
    %c0_1 = arith.constant 0 : index
    %c0_2 = arith.constant 0 : index
    %1 = vector.load %arg1[%c0_1, %c0_2] : memref<1x512xf32, #tpu.memory_space<vmem>>, vector<1x512xf32>
    %cst = arith.constant dense<0.000000e+00> : vector<64x512xf32>
    %2 = tpu.matmul %0, %1, %cst {dimension_numbers = #tpu.dot_dimension_numbers<[1], [0], [0], [1], [0, 0, 1, 1], [], []>} : vector<64x1xf32>, vector<1x512xf32>, vector<64x512xf32> -> vector<64x512xf32>
    %c0_3 = arith.constant 0 : index
    %c0_4 = arith.constant 0 : index
    %3 = vector.load %arg3[%c0_3, %c0_4] : memref<1x512xf32, #tpu.memory_space<vmem>>, vector<1x512xf32>
    %4 = vector.broadcast %3 : vector<1x512xf32> to vector<64x512xf32>
    %5 = arith.addf %2, %4 : vector<64x512xf32>
    %c0_5 = arith.constant 0 : index
    %c0_6 = arith.constant 0 : index
    %6 = vector.load %arg11[%c0_5, %c0_6] : memref<64x512xf32, #tpu.memory_space<vmem>>, vector<64x512xf32>
    tpu.vector_store %arg11[%c0_5, %c0_6], %5 {strides = array<i32>} : memref<64x512xf32, #tpu.memory_space<vmem>>, vector<64x512xf32>,
    %c0_7 = arith.constant 0 : index
    %c0_8 = arith.constant 0 : index
    %7 = vector.load %arg2[%c0_7, %c0_8] : memref<128x512xf32, #tpu.memory_space<vmem>>, vector<128x512xf32>
    %c0_9 = arith.constant 0 : index
    %c0_10 = arith.constant 0 : index
    %8 = vector.load %arg4[%c0_9, %c0_10] : memref<8x128xf32, #tpu.memory_space<vmem>>, vector<8x128xf32>
    %c0_11 = arith.constant 0 : index
    %c0_12 = arith.constant 0 : index
    %9 = vector.load %arg5[%c0_11, %c0_12] : memref<8x128xf32, #tpu.memory_space<vmem>>, vector<8x128xf32>
    %c0_13 = arith.constant 0 : index
    %c0_14 = arith.constant 0 : index
    %10 = vector.load %arg11[%c0_13, %c0_14] : memref<64x512xf32, #tpu.memory_space<vmem>>, vector<8x512xf32>
    %cst_15 = arith.constant dense<0.000000e+00> : vector<8x512xf32>
    %11 = tpu.matmul %8, %7, %cst_15 {dimension_numbers = #tpu.dot_dimension_numbers<[1], [0], [0], [1], [0, 0, 1, 1], [], []>} : vector<8x128xf32>, vector<128x512xf32>, vector<8x512xf32> -> vector<8x512xf32>
    %12 = arith.addf %10, %11 : vector<8x512xf32>
    %13 = vector.extract_strided_slice %12 {offsets = [0, 0], sizes = [8, 128], strides = [1, 1]} : vector<8x512xf32> to vector<8x128xf32>
    %14 = arith.negf %13 : vector<8x128xf32>
    %15 = math.exp %14 : vector<8x128xf32>
    %cst_16 = arith.constant 1.000000e+00 : f32
    %16 = vector.broadcast %cst_16 : f32 to vector<8x128xf32>
    %17 = arith.addf %16, %15 : vector<8x128xf32>
    %18 = arith.divf %16, %17 : vector<8x128xf32>
    %19 = vector.extract_strided_slice %12 {offsets = [0, 128], sizes = [8, 128], strides = [1, 1]} : vector<8x512xf32> to vector<8x128xf32>
    %20 = arith.negf %19 : vector<8x128xf32>
    %21 = math.exp %20 : vector<8x128xf32>
    %cst_17 = arith.constant 1.000000e+00 : f32
    %22 = vector.broadcast %cst_17 : f32 to vector<8x128xf32>
    %23 = arith.addf %22, %21 : vector<8x128xf32>
    %24 = arith.divf %22, %23 : vector<8x128xf32>
    %25 = vector.extract_strided_slice %12 {offsets = [0, 256], sizes = [8, 128], strides = [1, 1]} : vector<8x512xf32> to vector<8x128xf32>
    %26 = math.tanh %25 : vector<8x128xf32>
    %27 = vector.extract_strided_slice %12 {offsets = [0, 384], sizes = [8, 128], strides = [1, 1]} : vector<8x512xf32> to vector<8x128xf32>
    %28 = arith.negf %27 : vector<8x128xf32>
    %29 = math.exp %28 : vector<8x128xf32>
    %cst_18 = arith.constant 1.000000e+00 : f32
    %30 = vector.broadcast %cst_18 : f32 to vector<8x128xf32>
    %31 = arith.addf %30, %29 : vector<8x128xf32>
    %32 = arith.divf %30, %31 : vector<8x128xf32>
    %33 = arith.mulf %24, %9 : vector<8x128xf32>
    %34 = arith.mulf %18, %26 : vector<8x128xf32>
    %35 = arith.addf %33, %34 : vector<8x128xf32>
    %36 = math.tanh %35 : vector<8x128xf32>
    %37 = arith.mulf %32, %36 : vector<8x128xf32>
    %c8 = arith.constant 8 : index
    %c0_19 = arith.constant 0 : index
    %38 = vector.load %arg11[%c8, %c0_19] : memref<64x512xf32, #tpu.memory_space<vmem>>, vector<8x512xf32>
    %cst_20 = arith.constant dense<0.000000e+00> : vector<8x512xf32>
    %39 = tpu.matmul %37, %7, %cst_20 {dimension_numbers = #tpu.dot_dimension_numbers<[1], [0], [0], [1], [0, 0, 1, 1], [], []>} : vector<8x128xf32>, vector<128x512xf32>, vector<8x512xf32> -> vector<8x512xf32>
    %40 = arith.addf %38, %39 : vector<8x512xf32>
    %41 = vector.extract_strided_slice %40 {offsets = [0, 0], sizes = [8, 128], strides = [1, 1]} : vector<8x512xf32> to vector<8x128xf32>
    %42 = arith.negf %41 : vector<8x128xf32>
    %43 = math.exp %42 : vector<8x128xf32>
    %cst_21 = arith.constant 1.000000e+00 : f32
    %44 = vector.broadcast %cst_21 : f32 to vector<8x128xf32>
    %45 = arith.addf %44, %43 : vector<8x128xf32>
    %46 = arith.divf %44, %45 : vector<8x128xf32>
    %47 = vector.extract_strided_slice %40 {offsets = [0, 128], sizes = [8, 128], strides = [1, 1]} : vector<8x512xf32> to vector<8x128xf32>
    %48 = arith.negf %47 : vector<8x128xf32>
    %49 = math.exp %48 : vector<8x128xf32>
    %cst_22 = arith.constant 1.000000e+00 : f32
    %50 = vector.broadcast %cst_22 : f32 to vector<8x128xf32>
    %51 = arith.addf %50, %49 : vector<8x128xf32>
    %52 = arith.divf %50, %51 : vector<8x128xf32>
    %53 = vector.extract_strided_slice %40 {offsets = [0, 256], sizes = [8, 128], strides = [1, 1]} : vector<8x512xf32> to vector<8x128xf32>
    %54 = math.tanh %53 : vector<8x128xf32>
    %55 = vector.extract_strided_slice %40 {offsets = [0, 384], sizes = [8, 128], strides = [1, 1]} : vector<8x512xf32> to vector<8x128xf32>
    %56 = arith.negf %55 : vector<8x128xf32>
    %57 = math.exp %56 : vector<8x128xf32>
    %cst_23 = arith.constant 1.000000e+00 : f32
    %58 = vector.broadcast %cst_23 : f32 to vector<8x128xf32>
    %59 = arith.addf %58, %57 : vector<8x128xf32>
    %60 = arith.divf %58, %59 : vector<8x128xf32>
    %61 = arith.mulf %52, %35 : vector<8x128xf32>
    %62 = arith.mulf %46, %54 : vector<8x128xf32>
    %63 = arith.addf %61, %62 : vector<8x128xf32>
    %64 = math.tanh %63 : vector<8x128xf32>
    %65 = arith.mulf %60, %64 : vector<8x128xf32>
    %c16 = arith.constant 16 : index
    %c0_24 = arith.constant 0 : index
    %66 = vector.load %arg11[%c16, %c0_24] : memref<64x512xf32, #tpu.memory_space<vmem>>, vector<8x512xf32>
    %cst_25 = arith.constant dense<0.000000e+00> : vector<8x512xf32>
    %67 = tpu.matmul %65, %7, %cst_25 {dimension_numbers = #tpu.dot_dimension_numbers<[1], [0], [0], [1], [0, 0, 1, 1], [], []>} : vector<8x128xf32>, vector<128x512xf32>, vector<8x512xf32> -> vector<8x512xf32>
    %68 = arith.addf %66, %67 : vector<8x512xf32>
    %69 = vector.extract_strided_slice %68 {offsets = [0, 0], sizes = [8, 128], strides = [1, 1]} : vector<8x512xf32> to vector<8x128xf32>
    %70 = arith.negf %69 : vector<8x128xf32>
    %71 = math.exp %70 : vector<8x128xf32>
    %cst_26 = arith.constant 1.000000e+00 : f32
    %72 = vector.broadcast %cst_26 : f32 to vector<8x128xf32>
    %73 = arith.addf %72, %71 : vector<8x128xf32>
    %74 = arith.divf %72, %73 : vector<8x128xf32>
    %75 = vector.extract_strided_slice %68 {offsets = [0, 128], sizes = [8, 128], strides = [1, 1]} : vector<8x512xf32> to vector<8x128xf32>
    %76 = arith.negf %75 : vector<8x128xf32>
    %77 = math.exp %76 : vector<8x128xf32>
    %cst_27 = arith.constant 1.000000e+00 : f32
    %78 = vector.broadcast %cst_27 : f32 to vector<8x128xf32>
    %79 = arith.addf %78, %77 : vector<8x128xf32>
    %80 = arith.divf %78, %79 : vector<8x128xf32>
    %81 = vector.extract_strided_slice %68 {offsets = [0, 256], sizes = [8, 128], strides = [1, 1]} : vector<8x512xf32> to vector<8x128xf32>
    %82 = math.tanh %81 : vector<8x128xf32>
    %83 = vector.extract_strided_slice %68 {offsets = [0, 384], sizes = [8, 128], strides = [1, 1]} : vector<8x512xf32> to vector<8x128xf32>
    %84 = arith.negf %83 : vector<8x128xf32>
    %85 = math.exp %84 : vector<8x128xf32>
    %cst_28 = arith.constant 1.000000e+00 : f32
    %86 = vector.broadcast %cst_28 : f32 to vector<8x128xf32>
    %87 = arith.addf %86, %85 : vector<8x128xf32>
    %88 = arith.divf %86, %87 : vector<8x128xf32>
    %89 = arith.mulf %80, %63 : vector<8x128xf32>
    %90 = arith.mulf %74, %82 : vector<8x128xf32>
    %91 = arith.addf %89, %90 : vector<8x128xf32>
    %92 = math.tanh %91 : vector<8x128xf32>
    %93 = arith.mulf %88, %92 : vector<8x128xf32>
    %c24 = arith.constant 24 : index
    %c0_29 = arith.constant 0 : index
    %94 = vector.load %arg11[%c24, %c0_29] : memref<64x512xf32, #tpu.memory_space<vmem>>, vector<8x512xf32>
    %cst_30 = arith.constant dense<0.000000e+00> : vector<8x512xf32>
    %95 = tpu.matmul %93, %7, %cst_30 {dimension_numbers = #tpu.dot_dimension_numbers<[1], [0], [0], [1], [0, 0, 1, 1], [], []>} : vector<8x128xf32>, vector<128x512xf32>, vector<8x512xf32> -> vector<8x512xf32>
    %96 = arith.addf %94, %95 : vector<8x512xf32>
    %97 = vector.extract_strided_slice %96 {offsets = [0, 0], sizes = [8, 128], strides = [1, 1]} : vector<8x512xf32> to vector<8x128xf32>
    %98 = arith.negf %97 : vector<8x128xf32>
    %99 = math.exp %98 : vector<8x128xf32>
    %cst_31 = arith.constant 1.000000e+00 : f32
    %100 = vector.broadcast %cst_31 : f32 to vector<8x128xf32>
    %101 = arith.addf %100, %99 : vector<8x128xf32>
    %102 = arith.divf %100, %101 : vector<8x128xf32>
    %103 = vector.extract_strided_slice %96 {offsets = [0, 128], sizes = [8, 128], strides = [1, 1]} : vector<8x512xf32> to vector<8x128xf32>
    %104 = arith.negf %103 : vector<8x128xf32>
    %105 = math.exp %104 : vector<8x128xf32>
    %cst_32 = arith.constant 1.000000e+00 : f32
    %106 = vector.broadcast %cst_32 : f32 to vector<8x128xf32>
    %107 = arith.addf %106, %105 : vector<8x128xf32>
    %108 = arith.divf %106, %107 : vector<8x128xf32>
    %109 = vector.extract_strided_slice %96 {offsets = [0, 256], sizes = [8, 128], strides = [1, 1]} : vector<8x512xf32> to vector<8x128xf32>
    %110 = math.tanh %109 : vector<8x128xf32>
    %111 = vector.extract_strided_slice %96 {offsets = [0, 384], sizes = [8, 128], strides = [1, 1]} : vector<8x512xf32> to vector<8x128xf32>
    %112 = arith.negf %111 : vector<8x128xf32>
    %113 = math.exp %112 : vector<8x128xf32>
    %cst_33 = arith.constant 1.000000e+00 : f32
    %114 = vector.broadcast %cst_33 : f32 to vector<8x128xf32>
    %115 = arith.addf %114, %113 : vector<8x128xf32>
    %116 = arith.divf %114, %115 : vector<8x128xf32>
    %117 = arith.mulf %108, %91 : vector<8x128xf32>
    %118 = arith.mulf %102, %110 : vector<8x128xf32>
    %119 = arith.addf %117, %118 : vector<8x128xf32>
    %120 = math.tanh %119 : vector<8x128xf32>
    %121 = arith.mulf %116, %120 : vector<8x128xf32>
    %c32 = arith.constant 32 : index
    %c0_34 = arith.constant 0 : index
    %122 = vector.load %arg11[%c32, %c0_34] : memref<64x512xf32, #tpu.memory_space<vmem>>, vector<8x512xf32>
    %cst_35 = arith.constant dense<0.000000e+00> : vector<8x512xf32>
    %123 = tpu.matmul %121, %7, %cst_35 {dimension_numbers = #tpu.dot_dimension_numbers<[1], [0], [0], [1], [0, 0, 1, 1], [], []>} : vector<8x128xf32>, vector<128x512xf32>, vector<8x512xf32> -> vector<8x512xf32>
    %124 = arith.addf %122, %123 : vector<8x512xf32>
    %125 = vector.extract_strided_slice %124 {offsets = [0, 0], sizes = [8, 128], strides = [1, 1]} : vector<8x512xf32> to vector<8x128xf32>
    %126 = arith.negf %125 : vector<8x128xf32>
    %127 = math.exp %126 : vector<8x128xf32>
    %cst_36 = arith.constant 1.000000e+00 : f32
    %128 = vector.broadcast %cst_36 : f32 to vector<8x128xf32>
    %129 = arith.addf %128, %127 : vector<8x128xf32>
    %130 = arith.divf %128, %129 : vector<8x128xf32>
    %131 = vector.extract_strided_slice %124 {offsets = [0, 128], sizes = [8, 128], strides = [1, 1]} : vector<8x512xf32> to vector<8x128xf32>
    %132 = arith.negf %131 : vector<8x128xf32>
    %133 = math.exp %132 : vector<8x128xf32>
    %cst_37 = arith.constant 1.000000e+00 : f32
    %134 = vector.broadcast %cst_37 : f32 to vector<8x128xf32>
    %135 = arith.addf %134, %133 : vector<8x128xf32>
    %136 = arith.divf %134, %135 : vector<8x128xf32>
    %137 = vector.extract_strided_slice %124 {offsets = [0, 256], sizes = [8, 128], strides = [1, 1]} : vector<8x512xf32> to vector<8x128xf32>
    %138 = math.tanh %137 : vector<8x128xf32>
    %139 = vector.extract_strided_slice %124 {offsets = [0, 384], sizes = [8, 128], strides = [1, 1]} : vector<8x512xf32> to vector<8x128xf32>
    %140 = arith.negf %139 : vector<8x128xf32>
    %141 = math.exp %140 : vector<8x128xf32>
    %cst_38 = arith.constant 1.000000e+00 : f32
    %142 = vector.broadcast %cst_38 : f32 to vector<8x128xf32>
    %143 = arith.addf %142, %141 : vector<8x128xf32>
    %144 = arith.divf %142, %143 : vector<8x128xf32>
    %145 = arith.mulf %136, %119 : vector<8x128xf32>
    %146 = arith.mulf %130, %138 : vector<8x128xf32>
    %147 = arith.addf %145, %146 : vector<8x128xf32>
    %148 = math.tanh %147 : vector<8x128xf32>
    %149 = arith.mulf %144, %148 : vector<8x128xf32>
    %c40 = arith.constant 40 : index
    %c0_39 = arith.constant 0 : index
    %150 = vector.load %arg11[%c40, %c0_39] : memref<64x512xf32, #tpu.memory_space<vmem>>, vector<8x512xf32>
    %cst_40 = arith.constant dense<0.000000e+00> : vector<8x512xf32>
    %151 = tpu.matmul %149, %7, %cst_40 {dimension_numbers = #tpu.dot_dimension_numbers<[1], [0], [0], [1], [0, 0, 1, 1], [], []>} : vector<8x128xf32>, vector<128x512xf32>, vector<8x512xf32> -> vector<8x512xf32>
    %152 = arith.addf %150, %151 : vector<8x512xf32>
    %153 = vector.extract_strided_slice %152 {offsets = [0, 0], sizes = [8, 128], strides = [1, 1]} : vector<8x512xf32> to vector<8x128xf32>
    %154 = arith.negf %153 : vector<8x128xf32>
    %155 = math.exp %154 : vector<8x128xf32>
    %cst_41 = arith.constant 1.000000e+00 : f32
    %156 = vector.broadcast %cst_41 : f32 to vector<8x128xf32>
    %157 = arith.addf %156, %155 : vector<8x128xf32>
    %158 = arith.divf %156, %157 : vector<8x128xf32>
    %159 = vector.extract_strided_slice %152 {offsets = [0, 128], sizes = [8, 128], strides = [1, 1]} : vector<8x512xf32> to vector<8x128xf32>
    %160 = arith.negf %159 : vector<8x128xf32>
    %161 = math.exp %160 : vector<8x128xf32>
    %cst_42 = arith.constant 1.000000e+00 : f32
    %162 = vector.broadcast %cst_42 : f32 to vector<8x128xf32>
    %163 = arith.addf %162, %161 : vector<8x128xf32>
    %164 = arith.divf %162, %163 : vector<8x128xf32>
    %165 = vector.extract_strided_slice %152 {offsets = [0, 256], sizes = [8, 128], strides = [1, 1]} : vector<8x512xf32> to vector<8x128xf32>
    %166 = math.tanh %165 : vector<8x128xf32>
    %167 = vector.extract_strided_slice %152 {offsets = [0, 384], sizes = [8, 128], strides = [1, 1]} : vector<8x512xf32> to vector<8x128xf32>
    %168 = arith.negf %167 : vector<8x128xf32>
    %169 = math.exp %168 : vector<8x128xf32>
    %cst_43 = arith.constant 1.000000e+00 : f32
    %170 = vector.broadcast %cst_43 : f32 to vector<8x128xf32>
    %171 = arith.addf %170, %169 : vector<8x128xf32>
    %172 = arith.divf %170, %171 : vector<8x128xf32>
    %173 = arith.mulf %164, %147 : vector<8x128xf32>
    %174 = arith.mulf %158, %166 : vector<8x128xf32>
    %175 = arith.addf %173, %174 : vector<8x128xf32>
    %176 = math.tanh %175 : vector<8x128xf32>
    %177 = arith.mulf %172, %176 : vector<8x128xf32>
    %c48 = arith.constant 48 : index
    %c0_44 = arith.constant 0 : index
    %178 = vector.load %arg11[%c48, %c0_44] : memref<64x512xf32, #tpu.memory_space<vmem>>, vector<8x512xf32>
    %cst_45 = arith.constant dense<0.000000e+00> : vector<8x512xf32>
    %179 = tpu.matmul %177, %7, %cst_45 {dimension_numbers = #tpu.dot_dimension_numbers<[1], [0], [0], [1], [0, 0, 1, 1], [], []>} : vector<8x128xf32>, vector<128x512xf32>, vector<8x512xf32> -> vector<8x512xf32>
    %180 = arith.addf %178, %179 : vector<8x512xf32>
    %181 = vector.extract_strided_slice %180 {offsets = [0, 0], sizes = [8, 128], strides = [1, 1]} : vector<8x512xf32> to vector<8x128xf32>
    %182 = arith.negf %181 : vector<8x128xf32>
    %183 = math.exp %182 : vector<8x128xf32>
    %cst_46 = arith.constant 1.000000e+00 : f32
    %184 = vector.broadcast %cst_46 : f32 to vector<8x128xf32>
    %185 = arith.addf %184, %183 : vector<8x128xf32>
    %186 = arith.divf %184, %185 : vector<8x128xf32>
    %187 = vector.extract_strided_slice %180 {offsets = [0, 128], sizes = [8, 128], strides = [1, 1]} : vector<8x512xf32> to vector<8x128xf32>
    %188 = arith.negf %187 : vector<8x128xf32>
    %189 = math.exp %188 : vector<8x128xf32>
    %cst_47 = arith.constant 1.000000e+00 : f32
    %190 = vector.broadcast %cst_47 : f32 to vector<8x128xf32>
    %191 = arith.addf %190, %189 : vector<8x128xf32>
    %192 = arith.divf %190, %191 : vector<8x128xf32>
    %193 = vector.extract_strided_slice %180 {offsets = [0, 256], sizes = [8, 128], strides = [1, 1]} : vector<8x512xf32> to vector<8x128xf32>
    %194 = math.tanh %193 : vector<8x128xf32>
    %195 = vector.extract_strided_slice %180 {offsets = [0, 384], sizes = [8, 128], strides = [1, 1]} : vector<8x512xf32> to vector<8x128xf32>
    %196 = arith.negf %195 : vector<8x128xf32>
    %197 = math.exp %196 : vector<8x128xf32>
    %cst_48 = arith.constant 1.000000e+00 : f32
    %198 = vector.broadcast %cst_48 : f32 to vector<8x128xf32>
    %199 = arith.addf %198, %197 : vector<8x128xf32>
    %200 = arith.divf %198, %199 : vector<8x128xf32>
    %201 = arith.mulf %192, %175 : vector<8x128xf32>
    %202 = arith.mulf %186, %194 : vector<8x128xf32>
    %203 = arith.addf %201, %202 : vector<8x128xf32>
    %204 = math.tanh %203 : vector<8x128xf32>
    %205 = arith.mulf %200, %204 : vector<8x128xf32>
    %c56 = arith.constant 56 : index
    %c0_49 = arith.constant 0 : index
    %206 = vector.load %arg11[%c56, %c0_49] : memref<64x512xf32, #tpu.memory_space<vmem>>, vector<8x512xf32>
    %cst_50 = arith.constant dense<0.000000e+00> : vector<8x512xf32>
    %207 = tpu.matmul %205, %7, %cst_50 {dimension_numbers = #tpu.dot_dimension_numbers<[1], [0], [0], [1], [0, 0, 1, 1], [], []>} : vector<8x128xf32>, vector<128x512xf32>, vector<8x512xf32> -> vector<8x512xf32>
    %208 = arith.addf %206, %207 : vector<8x512xf32>
    %209 = vector.extract_strided_slice %208 {offsets = [0, 0], sizes = [8, 128], strides = [1, 1]} : vector<8x512xf32> to vector<8x128xf32>
    %210 = arith.negf %209 : vector<8x128xf32>
    %211 = math.exp %210 : vector<8x128xf32>
    %cst_51 = arith.constant 1.000000e+00 : f32
    %212 = vector.broadcast %cst_51 : f32 to vector<8x128xf32>
    %213 = arith.addf %212, %211 : vector<8x128xf32>
    %214 = arith.divf %212, %213 : vector<8x128xf32>
    %215 = vector.extract_strided_slice %208 {offsets = [0, 128], sizes = [8, 128], strides = [1, 1]} : vector<8x512xf32> to vector<8x128xf32>
    %216 = arith.negf %215 : vector<8x128xf32>
    %217 = math.exp %216 : vector<8x128xf32>
    %cst_52 = arith.constant 1.000000e+00 : f32
    %218 = vector.broadcast %cst_52 : f32 to vector<8x128xf32>
    %219 = arith.addf %218, %217 : vector<8x128xf32>
    %220 = arith.divf %218, %219 : vector<8x128xf32>
    %221 = vector.extract_strided_slice %208 {offsets = [0, 256], sizes = [8, 128], strides = [1, 1]} : vector<8x512xf32> to vector<8x128xf32>
    %222 = math.tanh %221 : vector<8x128xf32>
    %223 = vector.extract_strided_slice %208 {offsets = [0, 384], sizes = [8, 128], strides = [1, 1]} : vector<8x512xf32> to vector<8x128xf32>
    %224 = arith.negf %223 : vector<8x128xf32>
    %225 = math.exp %224 : vector<8x128xf32>
    %cst_53 = arith.constant 1.000000e+00 : f32
    %226 = vector.broadcast %cst_53 : f32 to vector<8x128xf32>
    %227 = arith.addf %226, %225 : vector<8x128xf32>
    %228 = arith.divf %226, %227 : vector<8x128xf32>
    %229 = arith.mulf %220, %203 : vector<8x128xf32>
    %230 = arith.mulf %214, %222 : vector<8x128xf32>
    %231 = arith.addf %229, %230 : vector<8x128xf32>
    %232 = math.tanh %231 : vector<8x128xf32>
    %233 = arith.mulf %228, %232 : vector<8x128xf32>
    %c0_54 = arith.constant 0 : index
    %c0_55 = arith.constant 0 : index
    %234 = vector.load %arg9[%c0_54, %c0_55] : memref<8x128xf32, #tpu.memory_space<vmem>>, vector<8x128xf32>
    tpu.vector_store %arg9[%c0_54, %c0_55], %233 {strides = array<i32>} : memref<8x128xf32, #tpu.memory_space<vmem>>, vector<8x128xf32>,
    %c0_56 = arith.constant 0 : index
    %c0_57 = arith.constant 0 : index
    %235 = vector.load %arg10[%c0_56, %c0_57] : memref<8x128xf32, #tpu.memory_space<vmem>>, vector<8x128xf32>
    tpu.vector_store %arg10[%c0_56, %c0_57], %231 {strides = array<i32>} : memref<8x128xf32, #tpu.memory_space<vmem>>, vector<8x128xf32>,
    %c0_58 = arith.constant 0 : index
    %c0_59 = arith.constant 0 : index
    %236 = vector.load %arg6[%c0_58, %c0_59] : memref<128x128xf32, #tpu.memory_space<vmem>>, vector<128x128xf32>
    %cst_60 = arith.constant dense<0.000000e+00> : vector<8x128xf32>
    %237 = tpu.matmul %233, %236, %cst_60 {dimension_numbers = #tpu.dot_dimension_numbers<[1], [0], [0], [1], [0, 0, 1, 1], [], []>} : vector<8x128xf32>, vector<128x128xf32>, vector<8x128xf32> -> vector<8x128xf32>
    %c0_61 = arith.constant 0 : index
    %c0_62 = arith.constant 0 : index
    %238 = vector.load %arg7[%c0_61, %c0_62] : memref<1x128xf32, #tpu.memory_space<vmem>>, vector<1x128xf32>
    %239 = vector.broadcast %238 : vector<1x128xf32> to vector<8x128xf32>
    %240 = arith.addf %237, %239 : vector<8x128xf32>
    %c0_63 = arith.constant 0 : index
    %c0_64 = arith.constant 0 : index
    %241 = vector.load %arg8[%c0_63, %c0_64] : memref<8x128xf32, #tpu.memory_space<vmem>>, vector<8x128xf32>
    tpu.vector_store %arg8[%c0_63, %c0_64], %240 {strides = array<i32>} : memref<8x128xf32, #tpu.memory_space<vmem>>, vector<8x128xf32>,
    return
  }
}

</mosaic_0001>

<bundles_post_ra>
// kernel: tpu_custom_call.1
= control target key start
LH: loop header
LB: loop body
LE: loop exit
PB: predicated region body
PF: predicated region fallthrough
CT: control target
= control target key end

     0   :  { %16 = vsyncpa [#allocation4], 0  ;;  %s3583_s0 = inlined_call_operand.vmem [shape: f32[64,1], index: 0, kind: input, shape index: {}]   ;;  %s3584_s1 = inlined_call_operand.vmem [shape: f32[1,512], index: 1, kind: input, shape index: {}]   ;;  %s3585_s2 = inlined_call_operand.hbm [shape: f32[128,512], index: 2, kind: input, shape index: {}]   ;;  %s3586_s3 = inlined_call_operand.vmem [shape: f32[1,512], index: 3, kind: input, shape index: {}]   ;;  %s3587_s4 = inlined_call_operand.vmem [shape: f32[8,128], index: 4, kind: input, shape index: {}]   ;;  %s3588_s5 = inlined_call_operand.vmem [shape: f32[8,128], index: 5, kind: input, shape index: {}]   ;;  %s3589_s6 = inlined_call_operand.hbm [shape: f32[128,128], index: 6, kind: input, shape index: {}]   ;;  %s3590_s7 = inlined_call_operand.vmem [shape: f32[1,128], index: 7, kind: input, shape index: {}]   ;;  %s3591_s8 = inlined_call_operand.hbm [shape: f32[8,128], index: 8, kind: output, shape index: {0}]   ;;  %s3592_s9 = inlined_call_operand.hbm [shape: f32[8,128], index: 9, kind: output, shape index: {1}]   ;;  %s3593_s10 = inlined_call_operand.hbm [shape: f32[8,128], index: 10, kind: output, shape index: {2}]  }
   0x1   :  { %17 = vsyncpa [#allocation7], 0 }
   0x2   :  { %18 = vsyncpa [#allocation5], 0 }
   0x3   :  { %19 = vsyncpa [#allocation10], 0  ;;  %s2954_s13 = smov [#allocation3]   ;;  %s2836_s17 = scalar_lea.hbm %s3585_s2, 8192 }
   0x4   :  { %s29_s14 = sshll.u32 %s2954_s13, 4  ;;  %p2837_p0 = scmp.ne.s32.totalorder %s3585_s2, %s2836_s17  ;;  %s30_s14 = int_to_ptr.vmem [resolvable:$true] %s29_s14 }
   0x5   :  { %p2840_p1 = scmp.lt.u32.totalorder %s2836_s17, %s3585_s2 }
   0x7   :  { %p2842_p2 = pnand %p2840_p1, %p2837_p0 }
   0x9   :  { %2845 = shalt.err (!%p2842_p2)
}
   0xa   :  { %s2846_s22 = scalar_lea.vmem %s30_s14, 8192  ;;  %p2851_p4 = scmp.lt.s32.totalorder %s30_s14, %s30_s14 }
   0xb   :  { %p2847_p3 = scmp.ne.s32.totalorder %s30_s14, %s2846_s22  ;;  %p2852_p5 = scmp.lt.s32.totalorder %s2846_s22, %s2846_s22 }
   0xd   :  { %p2853_p6 = por %p2852_p5, %p2851_p4 }
   0xf   :  { %p2854_p7 = pnand %p2853_p6, %p2847_p3 }
  0x11   :  { %2857 = shalt.err (!%p2854_p7)
}
  0x12   :  { %s2955_s23 = smov 512   ;;  %s2956_s24 = smov 32  }
  0x13   :  { %35 = dma.hbm_to_vmem [thread:$0]  %s3585_s2, 8192, %s30_s14, [#allocation4], %s2955_s23, %s2955_s23, %s2956_s24  }
  0x14   :  { %s2957_s27 = smov [#allocation6]   ;;  %s2858_s11 = scalar_lea.hbm %s3589_s6, 2048 }
  0x15   :  { %s47_s28 = sshll.u32 %s2957_s27, 4  ;;  %p2859_p8 = scmp.ne.s32.totalorder %s3589_s6, %s2858_s11  ;;  %s48_s28 = int_to_ptr.vmem [resolvable:$true] %s47_s28 }
  0x16   :  { %p2862_p9 = scmp.lt.u32.totalorder %s2858_s11, %s3589_s6 }
  0x18   :  { %p2864_p10 = pnand %p2862_p9, %p2859_p8 }
  0x1a   :  { %2867 = shalt.err (!%p2864_p10)
}
  0x1b   :  { %s2868_s17 = scalar_lea.vmem %s48_s28, 2048  ;;  %p2873_p12 = scmp.lt.s32.totalorder %s48_s28, %s48_s28 }
  0x1c   :  { %p2869_p11 = scmp.ne.s32.totalorder %s48_s28, %s2868_s17  ;;  %p2874_p13 = scmp.lt.s32.totalorder %s2868_s17, %s2868_s17 }
  0x1e   :  { %p2875_p0 = por %p2874_p13, %p2873_p12 }
  0x20   :  { %p2876_p1 = pnand %p2875_p0, %p2869_p11 }
  0x22   :  { %2879 = shalt.err (!%p2876_p1)
}
  0x23   :  { %s2958_s2 = smov 128   ;;  %s2959_s14 = smov 8  }
  0x24   :  { %53 = dma.hbm_to_vmem [thread:$0]  %s3589_s6, 2048, %s48_s28, [#allocation7], %s2958_s2, %s2958_s2, %s2959_s14  }
  0x25   :  { %2946 = dma.done.wait [#allocation4], 8192  }
  0x26   :  { %2947 = vsyncadd [#allocation4], 4294959104 }
  0x27   :  { %2948 = dma.done.wait [#allocation7], 2048  }
  0x28   :  { %2949 = vsyncadd [#allocation7], 4294965248  ;;  %v73_v0 = vlaneseq  ;;  %v2960_v1 = vmov 0.0   ;;  %v70_v7 = vld [vmem:[%s3584_s1] sm:$0xf]  ;;  %vm135_vm0 = vcmask 1040384  }
  0x29   :  { %208 = vmatprep.mubr.f32.mxu0 %v2960_v1  ;;  %321 = vmatprep.mubr.f32.mxu1 %v2960_v1  ;;  %v62_v8 = vld [vmem:[%s3583_s0] sm:$0xff]  ;;  %v403_v11 = vld [vmem:[#allocation3 + $0x8] sm:$0xff]  ;;  %v405_v13 = vld [vmem:[#allocation3 + $0x18] sm:$0xff]  ;;  %vm110_vm1 = vcmask 7168   ;;  %vm2962_vm2 = vmmov 0  }
  0x2a   :  { %v3047_v2 = vshrl.u32 %v73_v0, 7  ;;  %v407_v12 = vld [vmem:[#allocation3 + $0x28] sm:$0xff]  ;;  %v409_v16 = vld [vmem:[#allocation3 + $0x38] sm:$0xff]  ;;  %v402_v17 = vld [vmem:[#allocation3] sm:$0xff] }
  0x2b   :  { %v406_v18 = vld [vmem:[#allocation3 + $0x20] sm:$0xff]  ;;  %v3069_v19 = vpack.c.bf16 %v407_v12, %v403_v11  ;;  %v3071_v20 = vpack.c.bf16 %v409_v16, %v405_v13  ;;  %v404_v22 = vld [vmem:[#allocation3 + $0x10] sm:$0xff]  ;;  %v411_v25 = vld [vmem:[#allocation3 + $0x48] sm:$0xff] }
  0x2c   :  { %v79_v3 = vsub.s32 1, %v3047_v2  ;;  %v87_v4 = vsub.s32 3, %v3047_v2  ;;  %v75_v5 = vsub.s32 0, %v3047_v2  ;;  %v83_v6 = vsub.s32 2, %v3047_v2  ;;  %v408_v23 = vld [vmem:[#allocation3 + $0x30] sm:$0xff]  ;;  %v415_v26 = vld [vmem:[#allocation3 + $0x68] sm:$0xff] }
  0x2d   :  { %v3073_v21 = vpack.c.bf16 %v406_v18, %v402_v17  ;;  %v3077_v24 = vpack.c.bf16 %v408_v23, %v404_v22  ;;  %v413_v27 = vld [vmem:[#allocation3 + $0x58] sm:$0xff]  ;;  %v410_v29 = vld [vmem:[#allocation3 + $0x40] sm:$0xff]  ;;  %v63_v31 = vld [vmem:[%s3583_s0 + $0x8] sm:$0xff]  ;;  %v3086_v32 = vpack.c.bf16 %v415_v26, %v411_v25 }
  0x2e   :  { %v101_v9 = vrot.slane %v70_v7, %v79_v3  ;;  %v109_v10 = vrot.slane %v70_v7, %v87_v4  ;;  %v97_v14 = vrot.slane %v70_v7, %v75_v5  ;;  %v105_v15 = vrot.slane %v70_v7, %v83_v6  ;;  %v417_v28 = vld [vmem:[#allocation3 + $0x78] sm:$0xff]  ;;  %v414_v30 = vld [vmem:[#allocation3 + $0x60] sm:$0xff]  ;;  %v412_v34 = vld [vmem:[#allocation3 + $0x50] sm:$0xff] }
  0x2f   :  { %v3088_v33 = vpack.c.bf16 %v417_v28, %v413_v27  ;;  %v416_v35 = vld [vmem:[#allocation3 + $0x70] sm:$0xff]  ;;  %v3092_v36 = vpack.c.bf16 %v414_v30, %v410_v29  ;;  %v419_v38 = vld [vmem:[#allocation3 + $0x88] sm:$0xff]  ;;  %v421_v40 = vld [vmem:[#allocation3 + $0x98] sm:$0xff] }
  0x30   :  { %1999 = vmatprep.subr.msk.mxu0 %vm135_vm0, %v101_v9  ;;  %2009 = vmatprep.subr.msk.mxu1 %vm135_vm0, %v109_v10  ;;  %v3094_v37 = vpack.c.bf16 %v416_v35, %v412_v34  ;;  %v423_v39 = vld [vmem:[#allocation3 + $0xa8] sm:$0xff]  ;;  %v425_v41 = vld [vmem:[#allocation3 + $0xb8] sm:$0xff]  ;;  %v418_v42 = vld [vmem:[#allocation3 + $0x80] sm:$0xff] }
  0x31   :  { %2000 = vmatpush1.msk.msra.mxu0 %vm135_vm0, %v97_v14  ;;  %2010 = vmatpush1.msk.msra.mxu1 %vm135_vm0, %v105_v15  ;;  %v422_v43 = vld [vmem:[#allocation3 + $0xa0] sm:$0xff]  ;;  %v420_v44 = vld [vmem:[#allocation3 + $0x90] sm:$0xff]  ;;  %v3105_v47 = vpack.c.bf16 %v423_v39, %v419_v38  ;;  %v3107_v48 = vpack.c.bf16 %v425_v41, %v421_v40  ;;  %v427_v49 = vld [vmem:[#allocation3 + $0xc8] sm:$0xff] }
  0x32   :  { %2001 = vmatmul.mubr.msk.f32.vlgmr.msra.gmra.mrb[0].mxu0 %vm110_vm1, %v62_v8  ;;  %2011 = vmatmul.mubr.msk.f32.vlgmr.msra.gmra.mrb[0].mxu1 %vm110_vm1, %v62_v8  ;;  %v424_v45 = vld [vmem:[#allocation3 + $0xb0] sm:$0xff]  ;;  %v431_v50 = vld [vmem:[#allocation3 + $0xe8] sm:$0xff]  ;;  %v3111_v51 = vpack.c.bf16 %v422_v43, %v418_v42  ;;  %v429_v53 = vld [vmem:[#allocation3 + $0xd8] sm:$0xff] }
  0x33   :  { %2097 = vmatprep.subr.bf16.mxu0 %v3069_v19  ;;  %2129 = vmatprep.subr.bf16.mxu1 %v3071_v20  ;;  %v64_v46 = vld [vmem:[%s3583_s0 + $0x10] sm:$0xff]  ;;  %v3113_v52 = vpack.c.bf16 %v424_v45, %v420_v44  ;;  %v433_v54 = vld [vmem:[#allocation3 + $0xf8] sm:$0xff]  ;;  %v426_v55 = vld [vmem:[#allocation3 + $0xc0] sm:$0xff]  ;;  %v3124_v60 = vpack.c.bf16 %v431_v50, %v427_v49 }
  0x34   :  { %2099 = vmatpush1.bf16.msra.mxu0 %v3073_v21  ;;  %2131 = vmatpush1.bf16.msra.mxu1 %v3077_v24  ;;  %v430_v56 = vld [vmem:[#allocation3 + $0xe0] sm:$0xff]  ;;  %v428_v57 = vld [vmem:[#allocation3 + $0xd0] sm:$0xff]  ;;  %v65_v59 = vld [vmem:[%s3583_s0 + $0x18] sm:$0xff]  ;;  %v3126_v61 = vpack.c.bf16 %v433_v54, %v429_v53 }
  0x35   :  { %214 = vmatprep.mubr.f32.mxu0 %v2960_v1  ;;  %327 = vmatprep.mubr.f32.mxu1 %v2960_v1  ;;  %v432_v58 = vld [vmem:[#allocation3 + $0xf0] sm:$0xff]  ;;  %v435_v62 = vld [vmem:[#allocation3 + $0x108] sm:$0xff]  ;;  %v3130_v0 = vpack.c.bf16 %v430_v56, %v426_v55  ;;  %v437_v8 = vld [vmem:[#allocation3 + $0x118] sm:$0xff] }
  0x36   :  { %2002 = vmatmul.mubr.msk.f32.gmra.mrb[2].mxu0 %vm110_vm1, %v63_v31  ;;  %2012 = vmatmul.mubr.msk.f32.gmra.mrb[2].mxu1 %vm110_vm1, %v63_v31  ;;  %v439_v63 = vld [vmem:[#allocation3 + $0x128] sm:$0xff]  ;;  %v3132_v7 = vpack.c.bf16 %v432_v58, %v428_v57  ;;  %v441_v9 = vld [vmem:[#allocation3 + $0x138] sm:$0xff]  ;;  %v434_v10 = vld [vmem:[#allocation3 + $0x100] sm:$0xff] }
  0x37   :  { %2101 = vmatprep.subr.bf16.mxu0 %v3086_v32  ;;  %2133 = vmatprep.subr.bf16.mxu1 %v3088_v33  ;;  %v438_v11 = vld [vmem:[#allocation3 + $0x120] sm:$0xff]  ;;  %v436_v12 = vld [vmem:[#allocation3 + $0x110] sm:$0xff]  ;;  %v3143_v15 = vpack.c.bf16 %v439_v63, %v435_v62  ;;  %v3145_v16 = vpack.c.bf16 %v441_v9, %v437_v8  ;;  %v443_v17 = vld [vmem:[#allocation3 + $0x148] sm:$0xff] }
  0x38   :  { %2103 = vmatpush1.bf16.msra.mxu0 %v3092_v36  ;;  %2135 = vmatpush1.bf16.msra.mxu1 %v3094_v37  ;;  %v440_v13 = vld [vmem:[#allocation3 + $0x130] sm:$0xff]  ;;  %v66_v14 = vld [vmem:[%s3583_s0 + $0x20] sm:$0xff]  ;;  %v447_v18 = vld [vmem:[#allocation3 + $0x168] sm:$0xff]  ;;  %v3149_v22 = vpack.c.bf16 %v438_v11, %v434_v10 }
  0x39   :  { %220 = vmatprep.mubr.f32.mxu0 %v2960_v1  ;;  %333 = vmatprep.mubr.f32.mxu1 %v2960_v1  ;;  %v3151_v23 = vpack.c.bf16 %v440_v13, %v436_v12  ;;  %v445_v25 = vld [vmem:[#allocation3 + $0x158] sm:$0xff]  ;;  %v442_v27 = vld [vmem:[#allocation3 + $0x140] sm:$0xff]  ;;  %v444_v29 = vld [vmem:[#allocation3 + $0x150] sm:$0xff]  ;;  %v3162_v34 = vpack.c.bf16 %v447_v18, %v443_v17 }
  0x3a   :  { %2003 = vmatmul.mubr.msk.f32.gmra.mrb[4].mxu0 %vm110_vm1, %v64_v46  ;;  %2013 = vmatmul.mubr.msk.f32.gmra.mrb[4].mxu1 %vm110_vm1, %v64_v46  ;;  %v449_v26 = vld [vmem:[#allocation3 + $0x178] sm:$0xff]  ;;  %v446_v28 = vld [vmem:[#allocation3 + $0x160] sm:$0xff]  ;;  %v448_v30 = vld [vmem:[#allocation3 + $0x170] sm:$0xff] }
  0x3b   :  { %2105 = vmatprep.subr.bf16.mxu0 %v3105_v47  ;;  %2137 = vmatprep.subr.bf16.mxu1 %v3107_v48  ;;  %v67_v31 = vld [vmem:[%s3583_s0 + $0x28] sm:$0xff]  ;;  %v3164_v35 = vpack.c.bf16 %v449_v26, %v445_v25  ;;  %v3168_v40 = vpack.c.bf16 %v446_v28, %v442_v27  ;;  %v3170_v41 = vpack.c.bf16 %v448_v30, %v444_v29  ;;  %v453_v42 = vld [vmem:[#allocation3 + $0x198] sm:$0xff]  ;;  %v450_v44 = vld [vmem:[#allocation3 + $0x180] sm:$0xff] }
  0x3c   :  { %2107 = vmatpush1.bf16.msra.mxu0 %v3111_v51  ;;  %2139 = vmatpush1.bf16.msra.mxu1 %v3113_v52  ;;  %v451_v38 = vld [vmem:[#allocation3 + $0x188] sm:$0xff]  ;;  %v457_v43 = vld [vmem:[#allocation3 + $0x1b8] sm:$0xff]  ;;  %v454_v45 = vld [vmem:[#allocation3 + $0x1a0] sm:$0xff] }
  0x3d   :  { %226 = vmatprep.mubr.f32.mxu0 %v2960_v1  ;;  %339 = vmatprep.mubr.f32.mxu1 %v2960_v1  ;;  %v455_v39 = vld [vmem:[#allocation3 + $0x1a8] sm:$0xff]  ;;  %v452_v46 = vld [vmem:[#allocation3 + $0x190] sm:$0xff]  ;;  %v3183_v54 = vpack.c.bf16 %v457_v43, %v453_v42  ;;  %v3187_v57 = vpack.c.bf16 %v454_v45, %v450_v44  ;;  %v465_v62 = vld [vmem:[#allocation3 + $0x1f8] sm:$0xff] }
  0x3e   :  { %2004 = vmatmul.mubr.msk.f32.gmra.mrb[6].mxu0 %vm110_vm1, %v65_v59  ;;  %2014 = vmatmul.mubr.msk.f32.gmra.mrb[6].mxu1 %vm110_vm1, %v65_v59  ;;  %v456_v49 = vld [vmem:[#allocation3 + $0x1b0] sm:$0xff]  ;;  %v3181_v53 = vpack.c.bf16 %v455_v39, %v451_v38  ;;  %v459_v55 = vld [vmem:[#allocation3 + $0x1c8] sm:$0xff]  ;;  %v461_v59 = vld [vmem:[#allocation3 + $0x1d8] sm:$0xff] }
  0x3f   :  { %2109 = vmatprep.subr.bf16.mxu0 %v3124_v60  ;;  %2141 = vmatprep.subr.bf16.mxu1 %v3126_v61  ;;  %v68_v50 = vld [vmem:[%s3583_s0 + $0x30] sm:$0xff]  ;;  %v463_v56 = vld [vmem:[#allocation3 + $0x1e8] sm:$0xff]  ;;  %v3189_v58 = vpack.c.bf16 %v456_v49, %v452_v46  ;;  %v458_v63 = vld [vmem:[#allocation3 + $0x1c0] sm:$0xff]  ;;  %v3202_v13 = vpack.c.bf16 %v465_v62, %v461_v59 }
  0x40   :  { %2111 = vmatpush1.bf16.msra.mxu0 %v3130_v0  ;;  %2143 = vmatpush1.bf16.msra.mxu1 %v3132_v7  ;;  %v462_v8 = vld [vmem:[#allocation3 + $0x1e0] sm:$0xff]  ;;  %v460_v9 = vld [vmem:[#allocation3 + $0x1d0] sm:$0xff]  ;;  %v69_v11 = vld [vmem:[%s3583_s0 + $0x38] sm:$0xff]  ;;  %v3200_v12 = vpack.c.bf16 %v463_v56, %v459_v55 }
  0x41   :  { %232 = vmatprep.mubr.f32.mxu0 %v2960_v1  ;;  %345 = vmatprep.mubr.f32.mxu1 %v2960_v1  ;;  %v464_v10 = vld [vmem:[#allocation3 + $0x1f0] sm:$0xff]  ;;  %v466_v18 = vld [vmem:[%s3587_s4] sm:$0xff] }
  0x42   :  { %2005 = vmatmul.mubr.msk.f32.gmra.mrb[8].mxu0 %vm110_vm1, %v66_v14  ;;  %2015 = vmatmul.mubr.msk.f32.gmra.mrb[8].mxu1 %vm110_vm1, %v66_v14  ;;  %v3206_v14 = vpack.c.bf16 %v462_v8, %v458_v63  ;;  %v3208_v17 = vpack.c.bf16 %v464_v10, %v460_v9  ;;  %v71_v25 = vld [vmem:[%s3586_s3] sm:$0xf] }
  0x43   :  { %2113 = vmatprep.subr.bf16.mxu0 %v3143_v15  ;;  %2145 = vmatprep.subr.bf16.mxu1 %v3145_v16  ;;  %v3264_v26 = vrot.slane %v71_v25, %v75_v5  ;;  %v3268_v27 = vrot.slane %v71_v25, %v79_v3  ;;  %v3274_v43 = vrot.slane %v71_v25, %v87_v4  ;;  %v467_v62 = vld [vmem:[%s3588_s5] sm:$0xff]  ;;  %s2963_s5 = smov [#allocation9]  }
  0x44   :  { %2115 = vmatpush1.bf16.msra.mxu0 %v3149_v22  ;;  %2147 = vmatpush1.bf16.msra.mxu1 %v3151_v23  ;;  %v3279_v3 = vrot.slane %v71_v25, %v83_v6  ;;  %s1972_s18 = sshll.u32 %s2963_s5, 4  ;;  %s1973_s18 = int_to_ptr.vmem [resolvable:$true] %s1972_s18 }
  0x45   :  { %238 = vmatprep.mubr.f32.mxu0 %v2960_v1  ;;  %351 = vmatprep.mubr.f32.mxu1 %v2960_v1  ;;  %s2880_s19 = scalar_lea.vmem %s1973_s18, 128  ;;  %p2885_p3 = scmp.lt.s32.totalorder %s1973_s18, %s1973_s18 }
  0x46   :  { %2006 = vmatmul.mubr.msk.f32.gmra.mrb[10].mxu0 %vm110_vm1, %v67_v31  ;;  %2016 = vmatmul.mubr.msk.f32.gmra.mrb[10].mxu1 %vm110_vm1, %v67_v31  ;;  %p2881_p2 = scmp.ne.s32.totalorder %s1973_s18, %s2880_s19  ;;  %p2886_p4 = scmp.lt.s32.totalorder %s2880_s19, %s2880_s19 }
  0x47   :  { %2117 = vmatprep.subr.bf16.mxu0 %v3162_v34  ;;  %2149 = vmatprep.subr.bf16.mxu1 %v3164_v35 }
  0x48   :  { %2119 = vmatpush1.bf16.msra.mxu0 %v3168_v40  ;;  %2151 = vmatpush1.bf16.msra.mxu1 %v3170_v41  ;;  %p2887_p5 = por %p2886_p4, %p2885_p3 }
  0x49   :  { %244 = vmatprep.mubr.f32.mxu0 %v2960_v1  ;;  %357 = vmatprep.mubr.f32.mxu1 %v2960_v1 }
  0x4a   :  { %2007 = vmatmul.mubr.msk.f32.gmra.mrb[12].mxu0 %vm110_vm1, %v68_v50  ;;  %2017 = vmatmul.mubr.msk.f32.gmra.mrb[12].mxu1 %vm110_vm1, %v68_v50  ;;  %p2888_p6 = pnand %p2887_p5, %p2881_p2 }
  0x4b   :  { %2121 = vmatprep.subr.bf16.mxu0 %v3181_v53  ;;  %2153 = vmatprep.subr.bf16.mxu1 %v3183_v54 }
  0x4c   :  { %2123 = vmatpush1.bf16.msra.mxu0 %v3187_v57  ;;  %2155 = vmatpush1.bf16.msra.mxu1 %v3189_v58 }
  0x4d   :  { %250 = vmatprep.mubr.f32.mxu0 %v2960_v1  ;;  %363 = vmatprep.mubr.f32.mxu1 %v2960_v1 }
  0x4e   :  { %2008 = vmatmul.mubr.msk.f32.gmra.mrb[14].mxu0 %vm110_vm1, %v69_v11  ;;  %2018 = vmatmul.mubr.msk.f32.gmra.mrb[14].mxu1 %vm110_vm1, %v69_v11 }
  0x4f   :  { %2125 = vmatprep.subr.bf16.mxu0 %v3200_v12  ;;  %2157 = vmatprep.subr.bf16.mxu1 %v3202_v13 }
  0x50   :  { %2127 = vmatpush1.bf16.msra.mxu0 %v3206_v14  ;;  %2159 = vmatpush1.bf16.msra.mxu1 %v3208_v17 }
  0x51   :  { %536 = vmatprep.mubr.f32.mxu0 %v2960_v1  ;;  %607 = vmatprep.mubr.f32.mxu1 %v2960_v1 }
  0x52   :  { %2161 = vmatprep.subr.bf16.mxu0 %v3069_v19  ;;  %2193 = vmatprep.subr.bf16.mxu1 %v3071_v20 }
  0x53   :  { %537 = vmatmul.mubr.f32.vlgmr.msra.gmra.mrb[0].mxu0 %v466_v18  ;;  %608 = vmatmul.mubr.f32.vlgmr.msra.gmra.mrb[0].mxu1 %v466_v18 }
  0x54   :  { %2163 = vmatpush1.bf16.msra.mxu0 %v3073_v21  ;;  %2195 = vmatpush1.bf16.msra.mxu1 %v3077_v24 }
  0x55   :  { %2165 = vmatprep.subr.bf16.mxu0 %v3086_v32  ;;  %2197 = vmatprep.subr.bf16.mxu1 %v3088_v33 }
  0x56   :  { %710 = vmatprep.mubr.f32.mxu0 %v2960_v1  ;;  %781 = vmatprep.mubr.f32.mxu1 %v2960_v1 }
  0x58   :  { %2167 = vmatpush1.bf16.msra.mxu0 %v3092_v36  ;;  %2199 = vmatpush1.bf16.msra.mxu1 %v3094_v37 }
  0x59   :  { %2169 = vmatprep.subr.bf16.mxu0 %v3105_v47  ;;  %2201 = vmatprep.subr.bf16.mxu1 %v3107_v48 }
  0x5c   :  { %2171 = vmatpush1.bf16.msra.mxu0 %v3111_v51  ;;  %2203 = vmatpush1.bf16.msra.mxu1 %v3113_v52 }
  0x5d   :  { %2173 = vmatprep.subr.bf16.mxu0 %v3124_v60  ;;  %2205 = vmatprep.subr.bf16.mxu1 %v3126_v61 }
  0x60   :  { %2175 = vmatpush1.bf16.msra.mxu0 %v3130_v0  ;;  %2207 = vmatpush1.bf16.msra.mxu1 %v3132_v7 }
  0x61   :  { %2177 = vmatprep.subr.bf16.mxu0 %v3143_v15  ;;  %2209 = vmatprep.subr.bf16.mxu1 %v3145_v16 }
  0x64   :  { %2179 = vmatpush1.bf16.msra.mxu0 %v3149_v22  ;;  %2211 = vmatpush1.bf16.msra.mxu1 %v3151_v23 }
  0x65   :  { %2181 = vmatprep.subr.bf16.mxu0 %v3162_v34  ;;  %2213 = vmatprep.subr.bf16.mxu1 %v3164_v35 }
  0x68   :  { %2183 = vmatpush1.bf16.msra.mxu0 %v3168_v40  ;;  %2215 = vmatpush1.bf16.msra.mxu1 %v3170_v41 }
  0x69   :  { %2185 = vmatprep.subr.bf16.mxu0 %v3181_v53  ;;  %2217 = vmatprep.subr.bf16.mxu1 %v3183_v54 }
  0x6c   :  { %2187 = vmatpush1.bf16.msra.mxu0 %v3187_v57  ;;  %2219 = vmatpush1.bf16.msra.mxu1 %v3189_v58 }
  0x6d   :  { %2189 = vmatprep.subr.bf16.mxu0 %v3200_v12  ;;  %2221 = vmatprep.subr.bf16.mxu1 %v3202_v13 }
  0x70   :  { %2191 = vmatpush1.bf16.msra.mxu0 %v3206_v14  ;;  %2223 = vmatpush1.bf16.msra.mxu1 %v3208_v17 }
  0x71   :  { %2225 = vmatprep.subr.bf16.mxu0 %v3069_v19  ;;  %2257 = vmatprep.subr.bf16.mxu1 %v3071_v20 }
 0x126   :  { %v538_v28 = vpop.f32.mrb[0].mxu0  ;;  %v609_v29 = vpop.f32.mrb[0].mxu1 }
 0x127   :  { %v2632_v30 = vadd.f32 %v538_v28, %v3264_v26  ;;  %v540_v31 = vpop.f32.mrb[1].mxu0  ;;  %v611_v38 = vpop.f32.mrb[1].mxu1  ;;  %v2648_v46 = vadd.f32 %v609_v29, %v3279_v3 }
 0x128   :  { %v2633_v39 = vadd.f32 %v540_v31, %v3268_v27  ;;  %v2649_v5 = vadd.f32 %v611_v38, %v3274_v43 }
 0x129   :  { %v2019_v42 = vmul.f32 -1.442695, %v2632_v30 }
 0x12a   :  { %v2020_v44 = vmul.f32 -1.442695, %v2633_v39  ;;  %v2021_v45 = vmul.f32 -1.442695, %v2649_v5 }
 0x12b   :  { %2708 = vpow2.f32 %v2019_v42 }
 0x12c   :  { %2710 = vpow2.f32 %v2020_v44 }
 0x12d   :  { %2712 = vpow2.f32 %v2021_v45 }
 0x12e   :  { %2714 = vtanh.f32 %v2648_v46 }
 0x135   :  { %v2709_v49 = vpop.eup %2708 }
 0x136   :  { %v2711_v50 = vpop.eup %2710  ;;  %v621_v55 = vadd.f32 1.0, %v2709_v49 }
 0x137   :  { %v627_v56 = vadd.f32 1.0, %v2711_v50  ;;  %v2713_v4 = vpop.eup %2712 }
 0x138   :  { %2716 = vrcp.f32 %v621_v55  ;;  %v2715_v59 = vpop.eup %2714  ;;  %v634_v8 = vadd.f32 1.0, %v2713_v4 }
 0x139   :  { %2718 = vrcp.f32 %v627_v56 }
 0x13a   :  { %2720 = vrcp.f32 %v634_v8 }
 0x142   :  { %v2717_v2 = vpop.eup %2716 }
 0x143   :  { %v2719_v6 = vpop.eup %2718  ;;  %v638_v63 = vmul.f32 %v2717_v2, %v2715_v59 }
 0x144   :  { %v637_v9 = vmul.f32 %v2719_v6, %v467_v62  ;;  %v2721_v11 = vpop.eup %2720 }
 0x146   :  { %v3285_v10 = vadd.f32 %v638_v63, %v637_v9 }
 0x148   :  { %2722 = vtanh.f32 %v3285_v10 }
 0x152   :  { %v2723_v18 = vpop.eup %2722 }
 0x153   :  { %v641_v25 = vmul.f32 %v2723_v18, %v2721_v11 }
 0x155   :  { %711 = vmatmul.mubr.f32.vlgmr.msra.gmra.mrb[2].mxu0 %v641_v25  ;;  %782 = vmatmul.mubr.f32.vlgmr.msra.gmra.mrb[2].mxu1 %v641_v25 }
 0x156   :  { %2227 = vmatpush1.bf16.msra.mxu0 %v3073_v21  ;;  %2259 = vmatpush1.bf16.msra.mxu1 %v3077_v24 }
 0x157   :  { %2229 = vmatprep.subr.bf16.mxu0 %v3086_v32  ;;  %2261 = vmatprep.subr.bf16.mxu1 %v3088_v33 }
 0x158   :  { %884 = vmatprep.mubr.f32.mxu0 %v2960_v1  ;;  %955 = vmatprep.mubr.f32.mxu1 %v2960_v1 }
 0x15a   :  { %2231 = vmatpush1.bf16.msra.mxu0 %v3092_v36  ;;  %2263 = vmatpush1.bf16.msra.mxu1 %v3094_v37 }
 0x15b   :  { %2233 = vmatprep.subr.bf16.mxu0 %v3105_v47  ;;  %2265 = vmatprep.subr.bf16.mxu1 %v3107_v48 }
 0x15e   :  { %2235 = vmatpush1.bf16.msra.mxu0 %v3111_v51  ;;  %2267 = vmatpush1.bf16.msra.mxu1 %v3113_v52 }
 0x15f   :  { %2237 = vmatprep.subr.bf16.mxu0 %v3124_v60  ;;  %2269 = vmatprep.subr.bf16.mxu1 %v3126_v61 }
 0x162   :  { %2239 = vmatpush1.bf16.msra.mxu0 %v3130_v0  ;;  %2271 = vmatpush1.bf16.msra.mxu1 %v3132_v7 }
 0x163   :  { %2241 = vmatprep.subr.bf16.mxu0 %v3143_v15  ;;  %2273 = vmatprep.subr.bf16.mxu1 %v3145_v16 }
 0x166   :  { %2243 = vmatpush1.bf16.msra.mxu0 %v3149_v22  ;;  %2275 = vmatpush1.bf16.msra.mxu1 %v3151_v23 }
 0x167   :  { %2245 = vmatprep.subr.bf16.mxu0 %v3162_v34  ;;  %2277 = vmatprep.subr.bf16.mxu1 %v3164_v35 }
 0x16a   :  { %2247 = vmatpush1.bf16.msra.mxu0 %v3168_v40  ;;  %2279 = vmatpush1.bf16.msra.mxu1 %v3170_v41 }
 0x16b   :  { %2249 = vmatprep.subr.bf16.mxu0 %v3181_v53  ;;  %2281 = vmatprep.subr.bf16.mxu1 %v3183_v54 }
 0x16e   :  { %2251 = vmatpush1.bf16.msra.mxu0 %v3187_v57  ;;  %2283 = vmatpush1.bf16.msra.mxu1 %v3189_v58 }
 0x16f   :  { %2253 = vmatprep.subr.bf16.mxu0 %v3200_v12  ;;  %2285 = vmatprep.subr.bf16.mxu1 %v3202_v13 }
 0x172   :  { %2255 = vmatpush1.bf16.msra.mxu0 %v3206_v14  ;;  %2287 = vmatpush1.bf16.msra.mxu1 %v3208_v17 }
 0x173   :  { %2289 = vmatprep.subr.bf16.mxu0 %v3069_v19  ;;  %2321 = vmatprep.subr.bf16.mxu1 %v3071_v20 }
 0x228   :  { %v712_v28 = vpop.f32.mrb[2].mxu0  ;;  %v783_v29 = vpop.f32.mrb[2].mxu1 }
 0x229   :  { %v2634_v30 = vadd.f32 %v712_v28, %v3264_v26  ;;  %v714_v31 = vpop.f32.mrb[3].mxu0  ;;  %v785_v38 = vpop.f32.mrb[3].mxu1  ;;  %v2650_v46 = vadd.f32 %v783_v29, %v3279_v3 }
 0x22a   :  { %v2635_v39 = vadd.f32 %v714_v31, %v3268_v27  ;;  %v2651_v5 = vadd.f32 %v785_v38, %v3274_v43 }
 0x22b   :  { %v2022_v42 = vmul.f32 -1.442695, %v2634_v30 }
 0x22c   :  { %v2023_v44 = vmul.f32 -1.442695, %v2635_v39  ;;  %v2024_v45 = vmul.f32 -1.442695, %v2651_v5 }
 0x22d   :  { %2724 = vpow2.f32 %v2022_v42 }
 0x22e   :  { %2726 = vpow2.f32 %v2023_v44 }
 0x22f   :  { %2728 = vpow2.f32 %v2024_v45 }
 0x230   :  { %2730 = vtanh.f32 %v2650_v46 }
 0x237   :  { %v2725_v49 = vpop.eup %2724 }
 0x238   :  { %v2727_v50 = vpop.eup %2726  ;;  %v795_v55 = vadd.f32 1.0, %v2725_v49 }
 0x239   :  { %v801_v56 = vadd.f32 1.0, %v2727_v50  ;;  %v2729_v4 = vpop.eup %2728 }
 0x23a   :  { %2732 = vrcp.f32 %v795_v55  ;;  %v2731_v59 = vpop.eup %2730  ;;  %v808_v63 = vadd.f32 1.0, %v2729_v4 }
 0x23b   :  { %2734 = vrcp.f32 %v801_v56 }
 0x23c   :  { %2736 = vrcp.f32 %v808_v63 }
 0x244   :  { %v2733_v62 = vpop.eup %2732 }
 0x245   :  { %v2735_v2 = vpop.eup %2734  ;;  %v812_v6 = vmul.f32 %v2733_v62, %v2731_v59 }
 0x246   :  { %v811_v8 = vmul.f32 %v2735_v2, %v3285_v10  ;;  %v2737_v11 = vpop.eup %2736 }
 0x248   :  { %v3327_v9 = vadd.f32 %v812_v6, %v811_v8 }
 0x24a   :  { %2738 = vtanh.f32 %v3327_v9 }
 0x254   :  { %v2739_v18 = vpop.eup %2738 }
 0x255   :  { %v815_v25 = vmul.f32 %v2739_v18, %v2737_v11 }
 0x257   :  { %885 = vmatmul.mubr.f32.vlgmr.msra.gmra.mrb[4].mxu0 %v815_v25  ;;  %956 = vmatmul.mubr.f32.vlgmr.msra.gmra.mrb[4].mxu1 %v815_v25 }
 0x258   :  { %2291 = vmatpush1.bf16.msra.mxu0 %v3073_v21  ;;  %2323 = vmatpush1.bf16.msra.mxu1 %v3077_v24 }
 0x259   :  { %2293 = vmatprep.subr.bf16.mxu0 %v3086_v32  ;;  %2325 = vmatprep.subr.bf16.mxu1 %v3088_v33 }
 0x25a   :  { %1058 = vmatprep.mubr.f32.mxu0 %v2960_v1  ;;  %1129 = vmatprep.mubr.f32.mxu1 %v2960_v1 }
 0x25c   :  { %2295 = vmatpush1.bf16.msra.mxu0 %v3092_v36  ;;  %2327 = vmatpush1.bf16.msra.mxu1 %v3094_v37 }
 0x25d   :  { %2297 = vmatprep.subr.bf16.mxu0 %v3105_v47  ;;  %2329 = vmatprep.subr.bf16.mxu1 %v3107_v48 }
 0x260   :  { %2299 = vmatpush1.bf16.msra.mxu0 %v3111_v51  ;;  %2331 = vmatpush1.bf16.msra.mxu1 %v3113_v52 }
 0x261   :  { %2301 = vmatprep.subr.bf16.mxu0 %v3124_v60  ;;  %2333 = vmatprep.subr.bf16.mxu1 %v3126_v61 }
 0x264   :  { %2303 = vmatpush1.bf16.msra.mxu0 %v3130_v0  ;;  %2335 = vmatpush1.bf16.msra.mxu1 %v3132_v7 }
 0x265   :  { %2305 = vmatprep.subr.bf16.mxu0 %v3143_v15  ;;  %2337 = vmatprep.subr.bf16.mxu1 %v3145_v16 }
 0x268   :  { %2307 = vmatpush1.bf16.msra.mxu0 %v3149_v22  ;;  %2339 = vmatpush1.bf16.msra.mxu1 %v3151_v23 }
 0x269   :  { %2309 = vmatprep.subr.bf16.mxu0 %v3162_v34  ;;  %2341 = vmatprep.subr.bf16.mxu1 %v3164_v35 }
 0x26c   :  { %2311 = vmatpush1.bf16.msra.mxu0 %v3168_v40  ;;  %2343 = vmatpush1.bf16.msra.mxu1 %v3170_v41 }
 0x26d   :  { %2313 = vmatprep.subr.bf16.mxu0 %v3181_v53  ;;  %2345 = vmatprep.subr.bf16.mxu1 %v3183_v54 }
 0x270   :  { %2315 = vmatpush1.bf16.msra.mxu0 %v3187_v57  ;;  %2347 = vmatpush1.bf16.msra.mxu1 %v3189_v58 }
 0x271   :  { %2317 = vmatprep.subr.bf16.mxu0 %v3200_v12  ;;  %2349 = vmatprep.subr.bf16.mxu1 %v3202_v13 }
 0x274   :  { %2319 = vmatpush1.bf16.msra.mxu0 %v3206_v14  ;;  %2351 = vmatpush1.bf16.msra.mxu1 %v3208_v17 }
 0x275   :  { %2353 = vmatprep.subr.bf16.mxu0 %v3069_v19  ;;  %2385 = vmatprep.subr.bf16.mxu1 %v3071_v20 }
 0x32a   :  { %v886_v10 = vpop.f32.mrb[4].mxu0  ;;  %v957_v28 = vpop.f32.mrb[4].mxu1 }
 0x32b   :  { %v2636_v29 = vadd.f32 %v886_v10, %v3264_v26  ;;  %v888_v30 = vpop.f32.mrb[5].mxu0  ;;  %v959_v31 = vpop.f32.mrb[5].mxu1  ;;  %v2652_v45 = vadd.f32 %v957_v28, %v3279_v3 }
 0x32c   :  { %v2637_v38 = vadd.f32 %v888_v30, %v3268_v27  ;;  %v2653_v44 = vadd.f32 %v959_v31, %v3274_v43 }
 0x32d   :  { %v2025_v39 = vmul.f32 -1.442695, %v2636_v29 }
 0x32e   :  { %v2026_v42 = vmul.f32 -1.442695, %v2637_v38  ;;  %v2027_v5 = vmul.f32 -1.442695, %v2653_v44 }
 0x32f   :  { %2740 = vpow2.f32 %v2025_v39 }
 0x330   :  { %2742 = vpow2.f32 %v2026_v42 }
 0x331   :  { %2744 = vpow2.f32 %v2027_v5 }
 0x332   :  { %2746 = vtanh.f32 %v2652_v45 }
 0x339   :  { %v2741_v46 = vpop.eup %2740 }
 0x33a   :  { %v2743_v49 = vpop.eup %2742  ;;  %v969_v50 = vadd.f32 1.0, %v2741_v46 }
 0x33b   :  { %v975_v55 = vadd.f32 1.0, %v2743_v49  ;;  %v2745_v56 = vpop.eup %2744 }
 0x33c   :  { %2748 = vrcp.f32 %v969_v50  ;;  %v2747_v4 = vpop.eup %2746  ;;  %v982_v6 = vadd.f32 1.0, %v2745_v56 }
 0x33d   :  { %2750 = vrcp.f32 %v975_v55 }
 0x33e   :  { %2752 = vrcp.f32 %v982_v6 }
 0x346   :  { %v2749_v59 = vpop.eup %2748 }
 0x347   :  { %v2751_v62 = vpop.eup %2750  ;;  %v986_v2 = vmul.f32 %v2749_v59, %v2747_v4 }
 0x348   :  { %v985_v63 = vmul.f32 %v2751_v62, %v3327_v9  ;;  %v2753_v11 = vpop.eup %2752 }
 0x34a   :  { %v3369_v8 = vadd.f32 %v986_v2, %v985_v63 }
 0x34c   :  { %2754 = vtanh.f32 %v3369_v8 }
 0x356   :  { %v2755_v18 = vpop.eup %2754 }
 0x357   :  { %v989_v25 = vmul.f32 %v2755_v18, %v2753_v11 }
 0x359   :  { %1059 = vmatmul.mubr.f32.vlgmr.msra.gmra.mrb[6].mxu0 %v989_v25  ;;  %1130 = vmatmul.mubr.f32.vlgmr.msra.gmra.mrb[6].mxu1 %v989_v25 }
 0x35a   :  { %2355 = vmatpush1.bf16.msra.mxu0 %v3073_v21  ;;  %2387 = vmatpush1.bf16.msra.mxu1 %v3077_v24 }
 0x35b   :  { %2357 = vmatprep.subr.bf16.mxu0 %v3086_v32  ;;  %2389 = vmatprep.subr.bf16.mxu1 %v3088_v33 }
 0x35c   :  { %1232 = vmatprep.mubr.f32.mxu0 %v2960_v1  ;;  %1303 = vmatprep.mubr.f32.mxu1 %v2960_v1 }
 0x35e   :  { %2359 = vmatpush1.bf16.msra.mxu0 %v3092_v36  ;;  %2391 = vmatpush1.bf16.msra.mxu1 %v3094_v37 }
 0x35f   :  { %2361 = vmatprep.subr.bf16.mxu0 %v3105_v47  ;;  %2393 = vmatprep.subr.bf16.mxu1 %v3107_v48 }
 0x362   :  { %2363 = vmatpush1.bf16.msra.mxu0 %v3111_v51  ;;  %2395 = vmatpush1.bf16.msra.mxu1 %v3113_v52 }
 0x363   :  { %2365 = vmatprep.subr.bf16.mxu0 %v3124_v60  ;;  %2397 = vmatprep.subr.bf16.mxu1 %v3126_v61 }
 0x366   :  { %2367 = vmatpush1.bf16.msra.mxu0 %v3130_v0  ;;  %2399 = vmatpush1.bf16.msra.mxu1 %v3132_v7 }
 0x367   :  { %2369 = vmatprep.subr.bf16.mxu0 %v3143_v15  ;;  %2401 = vmatprep.subr.bf16.mxu1 %v3145_v16 }
 0x36a   :  { %2371 = vmatpush1.bf16.msra.mxu0 %v3149_v22  ;;  %2403 = vmatpush1.bf16.msra.mxu1 %v3151_v23 }
 0x36b   :  { %2373 = vmatprep.subr.bf16.mxu0 %v3162_v34  ;;  %2405 = vmatprep.subr.bf16.mxu1 %v3164_v35 }
 0x36e   :  { %2375 = vmatpush1.bf16.msra.mxu0 %v3168_v40  ;;  %2407 = vmatpush1.bf16.msra.mxu1 %v3170_v41 }
 0x36f   :  { %2377 = vmatprep.subr.bf16.mxu0 %v3181_v53  ;;  %2409 = vmatprep.subr.bf16.mxu1 %v3183_v54 }
 0x372   :  { %2379 = vmatpush1.bf16.msra.mxu0 %v3187_v57  ;;  %2411 = vmatpush1.bf16.msra.mxu1 %v3189_v58 }
 0x373   :  { %2381 = vmatprep.subr.bf16.mxu0 %v3200_v12  ;;  %2413 = vmatprep.subr.bf16.mxu1 %v3202_v13 }
 0x376   :  { %2383 = vmatpush1.bf16.msra.mxu0 %v3206_v14  ;;  %2415 = vmatpush1.bf16.msra.mxu1 %v3208_v17 }
 0x377   :  { %2417 = vmatprep.subr.bf16.mxu0 %v3069_v19  ;;  %2449 = vmatprep.subr.bf16.mxu1 %v3071_v20 }
 0x42c   :  { %v1060_v9 = vpop.f32.mrb[6].mxu0  ;;  %v1131_v10 = vpop.f32.mrb[6].mxu1 }
 0x42d   :  { %v2638_v28 = vadd.f32 %v1060_v9, %v3264_v26  ;;  %v1062_v29 = vpop.f32.mrb[7].mxu0  ;;  %v1133_v30 = vpop.f32.mrb[7].mxu1  ;;  %v2654_v5 = vadd.f32 %v1131_v10, %v3279_v3 }
 0x42e   :  { %v2639_v31 = vadd.f32 %v1062_v29, %v3268_v27  ;;  %v2655_v42 = vadd.f32 %v1133_v30, %v3274_v43 }
 0x42f   :  { %v2028_v38 = vmul.f32 -1.442695, %v2638_v28 }
 0x430   :  { %v2029_v39 = vmul.f32 -1.442695, %v2639_v31  ;;  %v2030_v44 = vmul.f32 -1.442695, %v2655_v42 }
 0x431   :  { %2756 = vpow2.f32 %v2028_v38 }
 0x432   :  { %2758 = vpow2.f32 %v2029_v39 }
 0x433   :  { %2760 = vpow2.f32 %v2030_v44 }
 0x434   :  { %2762 = vtanh.f32 %v2654_v5 }
 0x43b   :  { %v2757_v45 = vpop.eup %2756 }
 0x43c   :  { %v2759_v46 = vpop.eup %2758  ;;  %v1143_v49 = vadd.f32 1.0, %v2757_v45 }
 0x43d   :  { %v1149_v50 = vadd.f32 1.0, %v2759_v46  ;;  %v2761_v55 = vpop.eup %2760 }
 0x43e   :  { %2764 = vrcp.f32 %v1143_v49  ;;  %v2763_v56 = vpop.eup %2762  ;;  %v1156_v2 = vadd.f32 1.0, %v2761_v55 }
 0x43f   :  { %2766 = vrcp.f32 %v1149_v50 }
 0x440   :  { %2768 = vrcp.f32 %v1156_v2 }
 0x448   :  { %v2765_v4 = vpop.eup %2764 }
 0x449   :  { %v2767_v59 = vpop.eup %2766  ;;  %v1160_v62 = vmul.f32 %v2765_v4, %v2763_v56 }
 0x44a   :  { %v1159_v6 = vmul.f32 %v2767_v59, %v3369_v8  ;;  %v2769_v11 = vpop.eup %2768 }
 0x44c   :  { %v3411_v63 = vadd.f32 %v1160_v62, %v1159_v6 }
 0x44e   :  { %2770 = vtanh.f32 %v3411_v63 }
 0x458   :  { %v2771_v18 = vpop.eup %2770 }
 0x459   :  { %v1163_v25 = vmul.f32 %v2771_v18, %v2769_v11 }
 0x45b   :  { %1233 = vmatmul.mubr.f32.vlgmr.msra.gmra.mrb[8].mxu0 %v1163_v25  ;;  %1304 = vmatmul.mubr.f32.vlgmr.msra.gmra.mrb[8].mxu1 %v1163_v25 }
 0x45c   :  { %2419 = vmatpush1.bf16.msra.mxu0 %v3073_v21  ;;  %2451 = vmatpush1.bf16.msra.mxu1 %v3077_v24 }
 0x45d   :  { %2421 = vmatprep.subr.bf16.mxu0 %v3086_v32  ;;  %2453 = vmatprep.subr.bf16.mxu1 %v3088_v33 }
 0x45e   :  { %1406 = vmatprep.mubr.f32.mxu0 %v2960_v1  ;;  %1477 = vmatprep.mubr.f32.mxu1 %v2960_v1 }
 0x460   :  { %2423 = vmatpush1.bf16.msra.mxu0 %v3092_v36  ;;  %2455 = vmatpush1.bf16.msra.mxu1 %v3094_v37 }
 0x461   :  { %2425 = vmatprep.subr.bf16.mxu0 %v3105_v47  ;;  %2457 = vmatprep.subr.bf16.mxu1 %v3107_v48 }
 0x464   :  { %2427 = vmatpush1.bf16.msra.mxu0 %v3111_v51  ;;  %2459 = vmatpush1.bf16.msra.mxu1 %v3113_v52 }
 0x465   :  { %2429 = vmatprep.subr.bf16.mxu0 %v3124_v60  ;;  %2461 = vmatprep.subr.bf16.mxu1 %v3126_v61 }
 0x468   :  { %2431 = vmatpush1.bf16.msra.mxu0 %v3130_v0  ;;  %2463 = vmatpush1.bf16.msra.mxu1 %v3132_v7 }
 0x469   :  { %2433 = vmatprep.subr.bf16.mxu0 %v3143_v15  ;;  %2465 = vmatprep.subr.bf16.mxu1 %v3145_v16 }
 0x46c   :  { %2435 = vmatpush1.bf16.msra.mxu0 %v3149_v22  ;;  %2467 = vmatpush1.bf16.msra.mxu1 %v3151_v23 }
 0x46d   :  { %2437 = vmatprep.subr.bf16.mxu0 %v3162_v34  ;;  %2469 = vmatprep.subr.bf16.mxu1 %v3164_v35 }
 0x470   :  { %2439 = vmatpush1.bf16.msra.mxu0 %v3168_v40  ;;  %2471 = vmatpush1.bf16.msra.mxu1 %v3170_v41 }
 0x471   :  { %2441 = vmatprep.subr.bf16.mxu0 %v3181_v53  ;;  %2473 = vmatprep.subr.bf16.mxu1 %v3183_v54 }
 0x474   :  { %2443 = vmatpush1.bf16.msra.mxu0 %v3187_v57  ;;  %2475 = vmatpush1.bf16.msra.mxu1 %v3189_v58 }
 0x475   :  { %2445 = vmatprep.subr.bf16.mxu0 %v3200_v12  ;;  %2477 = vmatprep.subr.bf16.mxu1 %v3202_v13 }
 0x478   :  { %2447 = vmatpush1.bf16.msra.mxu0 %v3206_v14  ;;  %2479 = vmatpush1.bf16.msra.mxu1 %v3208_v17 }
 0x479   :  { %2481 = vmatprep.subr.bf16.mxu0 %v3069_v19  ;;  %2513 = vmatprep.subr.bf16.mxu1 %v3071_v20 }
 0x52e   :  { %v1234_v8 = vpop.f32.mrb[8].mxu0  ;;  %v1305_v9 = vpop.f32.mrb[8].mxu1 }
 0x52f   :  { %v2640_v10 = vadd.f32 %v1234_v8, %v3264_v26  ;;  %v1236_v28 = vpop.f32.mrb[9].mxu0  ;;  %v1307_v29 = vpop.f32.mrb[9].mxu1  ;;  %v2656_v44 = vadd.f32 %v1305_v9, %v3279_v3 }
 0x530   :  { %v2641_v30 = vadd.f32 %v1236_v28, %v3268_v27  ;;  %v2657_v39 = vadd.f32 %v1307_v29, %v3274_v43 }
 0x531   :  { %v2031_v31 = vmul.f32 -1.442695, %v2640_v10 }
 0x532   :  { %v2032_v38 = vmul.f32 -1.442695, %v2641_v30  ;;  %v2033_v42 = vmul.f32 -1.442695, %v2657_v39 }
 0x533   :  { %2772 = vpow2.f32 %v2031_v31 }
 0x534   :  { %2774 = vpow2.f32 %v2032_v38 }
 0x535   :  { %2776 = vpow2.f32 %v2033_v42 }
 0x536   :  { %2778 = vtanh.f32 %v2656_v44 }
 0x53d   :  { %v2773_v5 = vpop.eup %2772 }
 0x53e   :  { %v2775_v45 = vpop.eup %2774  ;;  %v1317_v46 = vadd.f32 1.0, %v2773_v5 }
 0x53f   :  { %v1323_v49 = vadd.f32 1.0, %v2775_v45  ;;  %v2777_v50 = vpop.eup %2776 }
 0x540   :  { %2780 = vrcp.f32 %v1317_v46  ;;  %v2779_v55 = vpop.eup %2778  ;;  %v1330_v62 = vadd.f32 1.0, %v2777_v50 }
 0x541   :  { %2782 = vrcp.f32 %v1323_v49 }
 0x542   :  { %2784 = vrcp.f32 %v1330_v62 }
 0x54a   :  { %v2781_v56 = vpop.eup %2780 }
 0x54b   :  { %v2783_v4 = vpop.eup %2782  ;;  %v1334_v59 = vmul.f32 %v2781_v56, %v2779_v55 }
 0x54c   :  { %v1333_v2 = vmul.f32 %v2783_v4, %v3411_v63  ;;  %v2785_v11 = vpop.eup %2784 }
 0x54e   :  { %v3453_v6 = vadd.f32 %v1334_v59, %v1333_v2 }
 0x550   :  { %2786 = vtanh.f32 %v3453_v6 }
 0x55a   :  { %v2787_v18 = vpop.eup %2786 }
 0x55b   :  { %v1337_v25 = vmul.f32 %v2787_v18, %v2785_v11  ;;  %v1865_v18 = vld [vmem:[#allocation6 + $0x18] sm:$0xff] }
 0x55d   :  { %1407 = vmatmul.mubr.f32.vlgmr.msra.gmra.mrb[10].mxu0 %v1337_v25  ;;  %1478 = vmatmul.mubr.f32.vlgmr.msra.gmra.mrb[10].mxu1 %v1337_v25 }
 0x55e   :  { %2483 = vmatpush1.bf16.msra.mxu0 %v3073_v21  ;;  %2515 = vmatpush1.bf16.msra.mxu1 %v3077_v24 }
 0x55f   :  { %2485 = vmatprep.subr.bf16.mxu0 %v3086_v32  ;;  %2517 = vmatprep.subr.bf16.mxu1 %v3088_v33 }
 0x560   :  { %1580 = vmatprep.mubr.f32.mxu0 %v2960_v1  ;;  %1651 = vmatprep.mubr.f32.mxu1 %v2960_v1 }
 0x562   :  { %2487 = vmatpush1.bf16.msra.mxu0 %v3092_v36  ;;  %2519 = vmatpush1.bf16.msra.mxu1 %v3094_v37 }
 0x563   :  { %2489 = vmatprep.subr.bf16.mxu0 %v3105_v47  ;;  %2521 = vmatprep.subr.bf16.mxu1 %v3107_v48 }
 0x566   :  { %2491 = vmatpush1.bf16.msra.mxu0 %v3111_v51  ;;  %2523 = vmatpush1.bf16.msra.mxu1 %v3113_v52 }
 0x567   :  { %2493 = vmatprep.subr.bf16.mxu0 %v3124_v60  ;;  %2525 = vmatprep.subr.bf16.mxu1 %v3126_v61 }
 0x56a   :  { %2495 = vmatpush1.bf16.msra.mxu0 %v3130_v0  ;;  %2527 = vmatpush1.bf16.msra.mxu1 %v3132_v7 }
 0x56b   :  { %2497 = vmatprep.subr.bf16.mxu0 %v3143_v15  ;;  %2529 = vmatprep.subr.bf16.mxu1 %v3145_v16 }
 0x56e   :  { %2499 = vmatpush1.bf16.msra.mxu0 %v3149_v22  ;;  %2531 = vmatpush1.bf16.msra.mxu1 %v3151_v23 }
 0x56f   :  { %2501 = vmatprep.subr.bf16.mxu0 %v3162_v34  ;;  %2533 = vmatprep.subr.bf16.mxu1 %v3164_v35 }
 0x572   :  { %2503 = vmatpush1.bf16.msra.mxu0 %v3168_v40  ;;  %2535 = vmatpush1.bf16.msra.mxu1 %v3170_v41 }
 0x573   :  { %2505 = vmatprep.subr.bf16.mxu0 %v3181_v53  ;;  %2537 = vmatprep.subr.bf16.mxu1 %v3183_v54 }
 0x576   :  { %2507 = vmatpush1.bf16.msra.mxu0 %v3187_v57  ;;  %2539 = vmatpush1.bf16.msra.mxu1 %v3189_v58 }
 0x577   :  { %2509 = vmatprep.subr.bf16.mxu0 %v3200_v12  ;;  %2541 = vmatprep.subr.bf16.mxu1 %v3202_v13 }
 0x57a   :  { %2511 = vmatpush1.bf16.msra.mxu0 %v3206_v14  ;;  %2543 = vmatpush1.bf16.msra.mxu1 %v3208_v17 }
 0x57b   :  { %2545 = vmatprep.subr.bf16.mxu0 %v3069_v19  ;;  %2577 = vmatprep.subr.bf16.mxu1 %v3071_v20 }
 0x630   :  { %v1408_v63 = vpop.f32.mrb[10].mxu0  ;;  %v1479_v8 = vpop.f32.mrb[10].mxu1 }
 0x631   :  { %v2642_v9 = vadd.f32 %v1408_v63, %v3264_v26  ;;  %v1410_v10 = vpop.f32.mrb[11].mxu0  ;;  %v1481_v28 = vpop.f32.mrb[11].mxu1  ;;  %v2658_v42 = vadd.f32 %v1479_v8, %v3279_v3  ;;  %v1866_v63 = vld [vmem:[#allocation6 + $0x20] sm:$0xff]  ;;  %v1867_v8 = vld [vmem:[#allocation6 + $0x28] sm:$0xff] }
 0x632   :  { %v2643_v29 = vadd.f32 %v1410_v10, %v3268_v27  ;;  %v2659_v38 = vadd.f32 %v1481_v28, %v3274_v43  ;;  %v1868_v10 = vld [vmem:[#allocation6 + $0x30] sm:$0xff]  ;;  %v1869_v28 = vld [vmem:[#allocation6 + $0x38] sm:$0xff] }
 0x633   :  { %v2034_v30 = vmul.f32 -1.442695, %v2642_v9  ;;  %v2615_v9 = vpack.c.bf16 %v1867_v8, %v1866_v63 }
 0x634   :  { %v2035_v31 = vmul.f32 -1.442695, %v2643_v29  ;;  %v2036_v39 = vmul.f32 -1.442695, %v2659_v38  ;;  %v2618_v29 = vpack.c.bf16 %v1869_v28, %v1868_v10 }
 0x635   :  { %2788 = vpow2.f32 %v2034_v30  ;;  %v1870_v30 = vld [vmem:[#allocation6 + $0x40] sm:$0xff] }
 0x636   :  { %2790 = vpow2.f32 %v2035_v31  ;;  %v1871_v31 = vld [vmem:[#allocation6 + $0x48] sm:$0xff] }
 0x637   :  { %2792 = vpow2.f32 %v2036_v39  ;;  %v2621_v38 = vpack.c.bf16 %v1871_v31, %v1870_v30  ;;  %v1872_v39 = vld [vmem:[#allocation6 + $0x50] sm:$0xff] }
 0x638   :  { %2794 = vtanh.f32 %v2658_v42  ;;  %v1873_v42 = vld [vmem:[#allocation6 + $0x58] sm:$0xff] }
 0x63f   :  { %v2789_v19 = vpop.eup %2788 }
 0x640   :  { %v2791_v44 = vpop.eup %2790  ;;  %v1491_v20 = vadd.f32 1.0, %v2789_v19  ;;  %v1874_v19 = vld [vmem:[#allocation6 + $0x60] sm:$0xff] }
 0x641   :  { %v1497_v5 = vadd.f32 1.0, %v2791_v44  ;;  %v2793_v45 = vpop.eup %2792  ;;  %v2624_v44 = vpack.c.bf16 %v1873_v42, %v1872_v39 }
 0x642   :  { %2796 = vrcp.f32 %v1491_v20  ;;  %v2795_v46 = vpop.eup %2794  ;;  %v1504_v56 = vadd.f32 1.0, %v2793_v45  ;;  %v1875_v20 = vld [vmem:[#allocation6 + $0x68] sm:$0xff]  ;;  %v1876_v45 = vld [vmem:[#allocation6 + $0x70] sm:$0xff] }
 0x643   :  { %2798 = vrcp.f32 %v1497_v5  ;;  %v2627_v5 = vpack.c.bf16 %v1875_v20, %v1874_v19 }
 0x644   :  { %2800 = vrcp.f32 %v1504_v56 }
 0x64c   :  { %v2797_v49 = vpop.eup %2796 }
 0x64d   :  { %v2799_v50 = vpop.eup %2798  ;;  %v1508_v55 = vmul.f32 %v2797_v49, %v2795_v46  ;;  %v1877_v46 = vld [vmem:[#allocation6 + $0x78] sm:$0xff] }
 0x64e   :  { %v1507_v4 = vmul.f32 %v2799_v50, %v3453_v6  ;;  %v2801_v62 = vpop.eup %2800  ;;  %v1864_v6 = vld [vmem:[#allocation6 + $0x10] sm:$0xff]  ;;  %v2630_v49 = vpack.c.bf16 %v1877_v46, %v1876_v45 }
 0x64f   :  { %v2612_v25 = vpack.c.bf16 %v1865_v18, %v1864_v6 }
 0x650   :  { %v3495_v59 = vadd.f32 %v1508_v55, %v1507_v4 }
 0x652   :  { %2802 = vtanh.f32 %v3495_v59 }
 0x65c   :  { %v2803_v2 = vpop.eup %2802 }
 0x65d   :  { %v1511_v11 = vmul.f32 %v2803_v2, %v2801_v62 }
 0x65f   :  { %1581 = vmatmul.mubr.f32.vlgmr.msra.gmra.mrb[12].mxu0 %v1511_v11  ;;  %1652 = vmatmul.mubr.f32.vlgmr.msra.gmra.mrb[12].mxu1 %v1511_v11 }
 0x660   :  { %2547 = vmatpush1.bf16.msra.mxu0 %v3073_v21  ;;  %2579 = vmatpush1.bf16.msra.mxu1 %v3077_v24 }
 0x661   :  { %2549 = vmatprep.subr.bf16.mxu0 %v3086_v32  ;;  %2581 = vmatprep.subr.bf16.mxu1 %v3088_v33 }
 0x662   :  { %1754 = vmatprep.mubr.f32.mxu0 %v2960_v1  ;;  %1825 = vmatprep.mubr.f32.mxu1 %v2960_v1 }
 0x664   :  { %2551 = vmatpush1.bf16.msra.mxu0 %v3092_v36  ;;  %2583 = vmatpush1.bf16.msra.mxu1 %v3094_v37 }
 0x665   :  { %2553 = vmatprep.subr.bf16.mxu0 %v3105_v47  ;;  %2585 = vmatprep.subr.bf16.mxu1 %v3107_v48 }
 0x668   :  { %2555 = vmatpush1.bf16.msra.mxu0 %v3111_v51  ;;  %2587 = vmatpush1.bf16.msra.mxu1 %v3113_v52 }
 0x669   :  { %2557 = vmatprep.subr.bf16.mxu0 %v3124_v60  ;;  %2589 = vmatprep.subr.bf16.mxu1 %v3126_v61 }
 0x66c   :  { %2559 = vmatpush1.bf16.msra.mxu0 %v3130_v0  ;;  %2591 = vmatpush1.bf16.msra.mxu1 %v3132_v7 }
 0x66d   :  { %2561 = vmatprep.subr.bf16.mxu0 %v3143_v15  ;;  %2593 = vmatprep.subr.bf16.mxu1 %v3145_v16 }
 0x670   :  { %2563 = vmatpush1.bf16.msra.mxu0 %v3149_v22  ;;  %2595 = vmatpush1.bf16.msra.mxu1 %v3151_v23 }
 0x671   :  { %2565 = vmatprep.subr.bf16.mxu0 %v3162_v34  ;;  %2597 = vmatprep.subr.bf16.mxu1 %v3164_v35 }
 0x674   :  { %2567 = vmatpush1.bf16.msra.mxu0 %v3168_v40  ;;  %2599 = vmatpush1.bf16.msra.mxu1 %v3170_v41 }
 0x675   :  { %2569 = vmatprep.subr.bf16.mxu0 %v3181_v53  ;;  %2601 = vmatprep.subr.bf16.mxu1 %v3183_v54 }
 0x678   :  { %2571 = vmatpush1.bf16.msra.mxu0 %v3187_v57  ;;  %2603 = vmatpush1.bf16.msra.mxu1 %v3189_v58 }
 0x679   :  { %2573 = vmatprep.subr.bf16.mxu0 %v3200_v12  ;;  %2605 = vmatprep.subr.bf16.mxu1 %v3202_v13  ;;  %v1862_v12 = vld [vmem:[#allocation6] sm:$0xff]  ;;  %v1863_v13 = vld [vmem:[#allocation6 + $0x8] sm:$0xff] }
 0x67c   :  { %2575 = vmatpush1.bf16.msra.mxu0 %v3206_v14  ;;  %2607 = vmatpush1.bf16.msra.mxu1 %v3208_v17  ;;  %v2609_v14 = vpack.c.bf16 %v1863_v13, %v1862_v12  ;;  %v2961_v17 = vmov 0.0|0.0  }
 0x67d   :  { %2608 = vmatprep.subr.bf16.mxu0 %v2961_v17 }
 0x732   :  { %v1582_v21 = vpop.f32.mrb[12].mxu0  ;;  %v1653_v24 = vpop.f32.mrb[12].mxu1 }
 0x733   :  { %v2644_v32 = vadd.f32 %v1582_v21, %v3264_v26  ;;  %v1584_v33 = vpop.f32.mrb[13].mxu0  ;;  %v1655_v36 = vpop.f32.mrb[13].mxu1  ;;  %v2660_v60 = vadd.f32 %v1653_v24, %v3279_v3 }
 0x734   :  { %v2645_v37 = vadd.f32 %v1584_v33, %v3268_v27  ;;  %v2661_v51 = vadd.f32 %v1655_v36, %v3274_v43 }
 0x735   :  { %v2037_v47 = vmul.f32 -1.442695, %v2644_v32 }
 0x736   :  { %v2038_v48 = vmul.f32 -1.442695, %v2645_v37  ;;  %v2039_v52 = vmul.f32 -1.442695, %v2661_v51 }
 0x737   :  { %2804 = vpow2.f32 %v2037_v47 }
 0x738   :  { %2806 = vpow2.f32 %v2038_v48 }
 0x739   :  { %2808 = vpow2.f32 %v2039_v52 }
 0x73a   :  { %2810 = vtanh.f32 %v2660_v60 }
 0x741   :  { %v2805_v61 = vpop.eup %2804 }
 0x742   :  { %v2807_v0 = vpop.eup %2806  ;;  %v1665_v7 = vadd.f32 1.0, %v2805_v61 }
 0x743   :  { %v1671_v15 = vadd.f32 1.0, %v2807_v0  ;;  %v2809_v16 = vpop.eup %2808 }
 0x744   :  { %2812 = vrcp.f32 %v1665_v7  ;;  %v2811_v22 = vpop.eup %2810  ;;  %v1678_v40 = vadd.f32 1.0, %v2809_v16 }
 0x745   :  { %2814 = vrcp.f32 %v1671_v15 }
 0x746   :  { %2816 = vrcp.f32 %v1678_v40 }
 0x74e   :  { %v2813_v23 = vpop.eup %2812 }
 0x74f   :  { %v2815_v34 = vpop.eup %2814  ;;  %v1682_v35 = vmul.f32 %v2813_v23, %v2811_v22 }
 0x750   :  { %v1681_v41 = vmul.f32 %v2815_v34, %v3495_v59  ;;  %v2817_v54 = vpop.eup %2816 }
 0x752   :  { %v3535_v53 = vadd.f32 %v1682_v35, %v1681_v41 }
 0x754   :  { %2818 = vtanh.f32 %v3535_v53 }
 0x75e   :  { %v2819_v57 = vpop.eup %2818 }
 0x75f   :  { %v1685_v58 = vmul.f32 %v2819_v57, %v2817_v54 }
 0x761   :  { %1755 = vmatmul.mubr.f32.vlgmr.msra.gmra.mrb[14].mxu0 %v1685_v58  ;;  %1826 = vmatmul.mubr.f32.vlgmr.msra.gmra.mrb[14].mxu1 %v1685_v58 }
 0x762   :  { %2610 = vmatpush3.bf16.msra.mxu0 %v2609_v14  ;;  %2093 = vmatprep.mubr.msk.f32.mxu0 %vm2962_vm2, %v2960_v1 }
 0x763   :  { %2611 = vmatprep.subr.bf16.mxu0 %v2961_v17 }
 0x766   :  { %2613 = vmatpush3.bf16.msra.mxu0 %v2612_v25 }
 0x767   :  { %2614 = vmatprep.subr.bf16.mxu0 %v2961_v17 }
 0x76a   :  { %2616 = vmatpush3.bf16.msra.mxu0 %v2615_v9 }
 0x76b   :  { %2617 = vmatprep.subr.bf16.mxu0 %v2961_v17 }
 0x76e   :  { %2619 = vmatpush3.bf16.msra.mxu0 %v2618_v29 }
 0x76f   :  { %2620 = vmatprep.subr.bf16.mxu0 %v2961_v17 }
 0x772   :  { %2622 = vmatpush3.bf16.msra.mxu0 %v2621_v38 }
 0x773   :  { %2623 = vmatprep.subr.bf16.mxu0 %v2961_v17 }
 0x776   :  { %2625 = vmatpush3.bf16.msra.mxu0 %v2624_v44 }
 0x777   :  { %2626 = vmatprep.subr.bf16.mxu0 %v2961_v17 }
 0x77a   :  { %2628 = vmatpush3.bf16.msra.mxu0 %v2627_v5 }
 0x77b   :  { %2629 = vmatprep.subr.bf16.mxu0 %v2961_v17 }
 0x77e   :  { %2631 = vmatpush3.bf16.msra.mxu0 %v2630_v49 }
 0x834   :  { %v1756_v50 = vpop.f32.mrb[14].mxu0  ;;  %v1827_v55 = vpop.f32.mrb[14].mxu1 }
 0x835   :  { %v2646_v56 = vadd.f32 %v1756_v50, %v3264_v26  ;;  %v1758_v4 = vpop.f32.mrb[15].mxu0  ;;  %v1829_v59 = vpop.f32.mrb[15].mxu1  ;;  %v2662_v24 = vadd.f32 %v1827_v55, %v3279_v3 }
 0x836   :  { %v2647_v62 = vadd.f32 %v1758_v4, %v3268_v27  ;;  %v2663_v1 = vadd.f32 %v1829_v59, %v3274_v43 }
 0x837   :  { %v2040_v2 = vmul.f32 -1.442695, %v2646_v56 }
 0x838   :  { %v2041_v11 = vmul.f32 -1.442695, %v2647_v62  ;;  %v2042_v21 = vmul.f32 -1.442695, %v2663_v1 }
 0x839   :  { %2820 = vpow2.f32 %v2040_v2 }
 0x83a   :  { %2822 = vpow2.f32 %v2041_v11 }
 0x83b   :  { %2824 = vpow2.f32 %v2042_v21 }
 0x83c   :  { %2826 = vtanh.f32 %v2662_v24 }
 0x843   :  { %v2821_v32 = vpop.eup %2820 }
 0x844   :  { %v2823_v33 = vpop.eup %2822  ;;  %v1839_v36 = vadd.f32 1.0, %v2821_v32 }
 0x845   :  { %v1845_v37 = vadd.f32 1.0, %v2823_v33  ;;  %v2825_v26 = vpop.eup %2824 }
 0x846   :  { %2828 = vrcp.f32 %v1839_v36  ;;  %v2827_v47 = vpop.eup %2826  ;;  %v1852_v52 = vadd.f32 1.0, %v2825_v26 }
 0x847   :  { %2830 = vrcp.f32 %v1845_v37 }
 0x848   :  { %2832 = vrcp.f32 %v1852_v52 }
 0x850   :  { %v2829_v27 = vpop.eup %2828 }
 0x851   :  { %v2831_v48 = vpop.eup %2830  ;;  %v1856_v51 = vmul.f32 %v2829_v27, %v2827_v47 }
 0x852   :  { %v1855_v60 = vmul.f32 %v2831_v48, %v3535_v53  ;;  %v2833_v3 = vpop.eup %2832 }
 0x854   :  { %v1857_v43 = vadd.f32 %v1856_v51, %v1855_v60 }
 0x856   :  { %1861 = vst [vmem:[#allocation11] sm:$0xff] %v1857_v43  ;;  %2834 = vtanh.f32 %v1857_v43 }
 0x860   :  { %v2835_v61 = vpop.eup %2834 }
 0x861   :  { %v1859_v0 = vmul.f32 %v2835_v61, %v2833_v3 }
 0x863   :  { %2094 = vmatmul.mubr.f32.vlgmr.msra.gmra.mrb[16].mxu0 %v1859_v0  ;;  %1860 = vst [vmem:[#allocation9] sm:$0xff] %v1859_v0 }
 0x864   :  { %2891 = shalt.err (!%p2888_p6)
}
 0x865   :  { %s2892_s21 = scalar_lea.hbm %s3592_s9, 128 }
 0x866   :  { %p2893_p7 = scmp.ne.s32.totalorder %s3592_s9, %s2892_s21  ;;  %p2896_p8 = scmp.lt.u32.totalorder %s2892_s21, %s3592_s9 }
 0x868   :  { %p2898_p9 = pnand %p2896_p8, %p2893_p7 }
 0x86a   :  { %2901 = shalt.err (!%p2898_p9)
}
 0x86b   :  { %1975 = dma.vmem_to_hbm [thread:$0]  %s1973_s18, 128, %s3592_s9, [#allocation10]  }
 0x86c   :  { %s2964_s27 = smov [#allocation11]  }
 0x86d   :  { %s1982_s28 = sshll.u32 %s2964_s27, 4  ;;  %s1983_s28 = int_to_ptr.vmem [resolvable:$true] %s1982_s28 }
 0x86e   :  { %s2902_s29 = scalar_lea.vmem %s1983_s28, 128  ;;  %p2907_p11 = scmp.lt.s32.totalorder %s1983_s28, %s1983_s28 }
 0x86f   :  { %p2903_p10 = scmp.ne.s32.totalorder %s1983_s28, %s2902_s29  ;;  %p2908_p12 = scmp.lt.s32.totalorder %s2902_s29, %s2902_s29 }
 0x871   :  { %p2909_p13 = por %p2908_p12, %p2907_p11 }
 0x873   :  { %p2910_p0 = pnand %p2909_p13, %p2903_p10 }
 0x875   :  { %2913 = shalt.err (!%p2910_p0)
}
 0x876   :  { %s2914_s12 = scalar_lea.hbm %s3593_s10, 128 }
 0x877   :  { %p2915_p1 = scmp.ne.s32.totalorder %s3593_s10, %s2914_s12  ;;  %p2918_p2 = scmp.lt.u32.totalorder %s2914_s12, %s3593_s10 }
 0x879   :  { %p2920_p3 = pnand %p2918_p2, %p2915_p1 }
 0x87b   :  { %2923 = shalt.err (!%p2920_p3)
}
 0x87c   :  { %1985 = dma.vmem_to_hbm [thread:$0]  %s1983_s28, 128, %s3593_s10, [#allocation10]   ;;  %v2043_v7 = vld [vmem:[%s3590_s7] ss:$0 sm:$0xff] }
 0x87d   :  { %s2965_s3 = smov [#allocation8]  }
 0x87e   :  { %s1962_s14 = sshll.u32 %s2965_s3, 4  ;;  %s1963_s14 = int_to_ptr.vmem [resolvable:$true] %s1962_s14 }
 0x87f   :  { %s2924_s5 = scalar_lea.vmem %s1963_s14, 128  ;;  %p2929_p5 = scmp.lt.s32.totalorder %s1963_s14, %s1963_s14 }
 0x880   :  { %p2925_p4 = scmp.ne.s32.totalorder %s1963_s14, %s2924_s5  ;;  %p2930_p6 = scmp.lt.s32.totalorder %s2924_s5, %s2924_s5 }
 0x882   :  { %p2931_p7 = por %p2930_p6, %p2929_p5 }
 0x884   :  { %p2932_p8 = pnand %p2931_p7, %p2925_p4 }
 0x936   :  { %v1951_v15 = vpop.f32.mrb[16].mxu0 }
 0x937   :  { %v1952_v16 = vadd.f32 %v2043_v7, %v1951_v15  ;;  %v2095_v22 = vpop.f32.mrb[17].mxu0 }
 0x939   :  { %1955 = vst [vmem:[#allocation8] sm:$0xff] %v1952_v16 }
 0x93a   :  { %2935 = shalt.err (!%p2932_p8)
}
 0x93b   :  { %s2936_s19 = scalar_lea.hbm %s3591_s8, 128 }
 0x93c   :  { %p2937_p9 = scmp.ne.s32.totalorder %s3591_s8, %s2936_s19  ;;  %p2940_p10 = scmp.lt.u32.totalorder %s2936_s19, %s3591_s8 }
 0x93e   :  { %p2942_p11 = pnand %p2940_p10, %p2937_p9 }
 0x940   :  { %2945 = shalt.err (!%p2942_p11)
}
 0x941   :  { %1965 = dma.vmem_to_hbm [thread:$0]  %s1963_s14, 128, %s3591_s8, [#allocation5]  }
 0x942   :  { %2950 = dma.done.wait [#allocation5], 128  }
 0x943   :  { %2951 = vsyncadd [#allocation5], 4294967168 }
 0x944   :  { %2952 = dma.done.wait [#allocation10], 256  }
 0x945   :  { %2953 = vsyncadd [#allocation10], 4294967040 }
 0x946   :  { %1995 = vsyncpa [#allocation4], 1 }
 0x947   :  { %1996 = vsyncpa [#allocation7], 1 }
 0x948   :  { %1997 = vsyncpa [#allocation5], 1 }
 0x949   :  { %1998 = vsyncpa [#allocation10], 1 }

</bundles_post_ra>
